<compile_context>
chip_gen: v7x
topology: tpu7x:2x2x1
jax: 0.10.0
libtpu: 0.0.40
codegen_flags: <defaults>
</compile_context>

<pallas_src>
import functools

import jax
import jax.numpy as jnp
from jax.experimental import pallas as pl
from jax.experimental.pallas import tpu as pltpu


_LANE = 128


def _round_up(x, m):
    return ((x + m - 1) // m) * m


def _cdiv(a, b):
    return (a + b - 1) // b


def _conv_mlp_kernel(x_ref, w1_ref, b1_ref, w2_ref, b2_ref, out_ref, *,
                     kernel_size, stride, output_size, mlp_hidden):
    """Fused unfold + Linear(K,H) + ReLU + Linear(H,1) over one lane tile.

    x_ref:  (S, M, tile_lanes) VMEM   de-interleaved padded input:
                                      x_ref[r, m, c] == x_padded[m*S + r, row c]
    w1_ref: (K, H) SMEM
    b1_ref: (H,)   SMEM
    w2_ref: (H,)   SMEM   (second Linear's weight, flattened)
    b2_ref: (1,)   SMEM
    out_ref:(O, tile_lanes) VMEM   batch*hidden rows lane-dense on the last dim
    """
    K, S, O, H = kernel_size, stride, output_size, mlp_hidden

    # Window taps: taps[k][o, c] == x_padded[o*S + k, row c].  With the
    # de-interleaved layout every tap is a contiguous static sublane slice.
    taps = []
    for k in range(K):
        r, q = k % S, k // S
        taps.append(x_ref[r, q:q + O, :].astype(jnp.float32))

    # MLP over the window dim as pure VPU math on lane-dense (O, tile_lanes)
    # tiles; weights are scalars read from SMEM (no degenerate MXU shapes).
    acc = jnp.zeros_like(taps[0]) + b2_ref[0]
    for j in range(H):
        pre = taps[0] * w1_ref[0, j]
        for k in range(1, K):
            pre = pre + taps[k] * w1_ref[k, j]
        pre = pre + b1_ref[j]
        acc = acc + jnp.maximum(pre, 0.0) * w2_ref[j]
    out_ref[...] = acc.astype(out_ref.dtype)


def simulate_conv1d(x, params, *, kernel_size, stride, padding,
                    max_tile_lanes=2048,
                    vmem_tile_budget_bytes=12 * 1024 * 1024):
    """x: (batch, hidden, input_size) -> (batch, hidden, output_size)."""
    w1, b1, w2, b2 = params
    batch, hidden, input_size = x.shape
    K, S = kernel_size, stride
    H = w1.shape[1]
    O = (input_size - K + 2 * padding) // S + 1

    R = batch * hidden
    P = input_size + 2 * padding
    M = _cdiv(P, S)                 # spatial positions per stride-residue class
    P_pad = M * S

    # --- Tile selection: lane tiles sized from a VMEM budget (double-buffered
    # input + output -> fits v5e's 16 MiB scoped default and v7x's 64 MiB
    # physical VMEM), balanced across the grid, and >= 2 grid steps when there
    # is enough work so both v7x TensorCores get rows. ------------------------
    in_item = jnp.dtype(x.dtype).itemsize
    bytes_per_lane = 2 * (S * _round_up(M, 8) * in_item + _round_up(O, 8) * 4)
    tile_cap = (vmem_tile_budget_bytes // bytes_per_lane) // _LANE * _LANE
    tile_cap = max(_LANE, min(tile_cap, _round_up(max_tile_lanes, _LANE)))

    R_rnd = _round_up(R, _LANE)
    n_tiles = _cdiv(R_rnd, tile_cap)
    if n_tiles == 1 and R_rnd >= 2 * _LANE:
        n_tiles = 2                 # megacore: give both TensorCores work
    tile_lanes = _round_up(_cdiv(R_rnd, n_tiles), _LANE)
    n_tiles = _cdiv(R_rnd, tile_lanes)
    R_pad = n_tiles * tile_lanes

    # --- Lane-dense layout: rows on lanes, spatial on sublanes, stride
    # de-interleaved.  The conv zero-pad fuses with this (required) transpose
    # copy, so there is no separate pad round trip through HBM. ---------------
    xt = x.reshape(R, input_size).T                          # (input_size, R)
    xt = jnp.pad(xt, ((padding, padding + (P_pad - P)), (0, R_pad - R)))
    xd = xt.reshape(M, S, R_pad).transpose(1, 0, 2)          # (S, M, R_pad)

    kernel = functools.partial(
        _conv_mlp_kernel, kernel_size=K, stride=S,
        output_size=O, mlp_hidden=H)

    smem_spec = pl.BlockSpec(memory_space=pltpu.MemorySpace.SMEM)
    out = pl.pallas_call(
        kernel,
        out_shape=jax.ShapeDtypeStruct((O, R_pad), jnp.float32),
        grid_spec=pltpu.PrefetchScalarGridSpec(
            num_scalar_prefetch=0,
            grid=(n_tiles,),
            in_specs=[
                pl.BlockSpec((S, M, tile_lanes), lambda i: (0, 0, i)),  # x
                smem_spec,   # W1 (K, H)
                smem_spec,   # b1 (H,)
                smem_spec,   # W2 flattened (H,)
                smem_spec,   # b2 (1,)
            ],
            out_specs=pl.BlockSpec((O, tile_lanes), lambda i: (0, i)),
        ),
        compiler_params=pltpu.CompilerParams(
            dimension_semantics=("parallel",)),
    )(xd, w1, b1.reshape(-1), w2.reshape(-1), b2.reshape(-1))

    # Transpose the lane-dense (O, rows) result back to (batch, hidden, O).
    return out[:, :R].T.reshape(batch, hidden, O)


def init_net_params(key, kernel_size, mlp_hidden):
    """Params for net = Linear(K, mlp_hidden) -> ReLU -> Linear(mlp_hidden, 1)."""
    k1, k2, k3, k4 = jax.random.split(key, 4)
    w1 = jax.random.normal(k1, (kernel_size, mlp_hidden), jnp.float32) * 0.1
    b1 = jax.random.normal(k2, (1, mlp_hidden), jnp.float32) * 0.01
    w2 = jax.random.normal(k3, (mlp_hidden, 1), jnp.float32) * 0.1
    b2 = jax.random.normal(k4, (1, 1), jnp.float32) * 0.01
    return w1, b1, w2, b2


def _reference(x, params, kernel_size, stride, padding):
    """Pure-JAX mirror of the PyTorch forward (unfold + MLP)."""
    w1, b1, w2, b2 = params
    batch, hidden, input_size = x.shape
    O = (input_size - kernel_size + 2 * padding) // stride + 1
    xp = jnp.pad(x, ((0, 0), (0, 0), (padding, padding)))
    idx = (jnp.arange(O) * stride)[:, None] + jnp.arange(kernel_size)[None, :]
    win = xp[:, :, idx].reshape(-1, kernel_size).astype(jnp.float32)
    return (jnp.maximum(win @ w1 + b1, 0.0) @ w2 + b2).reshape(batch, hidden, O)


if __name__ == "__main__":
    key = jax.random.PRNGKey(0)
    k_x, k_p = jax.random.split(key)

    # Small shapes consistent with the module's forward.
    batch, hidden, input_size = 2, 4, 16
    kernel_size, stride, padding = 3, 1, 1
    mlp_hidden = 32

    x = jax.random.normal(k_x, (batch, hidden, input_size), jnp.float32)
    params = init_net_params(k_p, kernel_size, mlp_hidden)

    fn = jax.jit(functools.partial(simulate_conv1d,
                                   kernel_size=kernel_size,
                                   stride=stride,
                                   padding=padding))
    out = fn(x, params)
    jax.block_until_ready(out)

    output_size = (input_size - kernel_size + 2 * padding) // stride + 1
    ref = _reference(x, params, kernel_size, stride, padding)
    assert out.shape == (batch, hidden, output_size)
    assert jnp.allclose(out, ref, atol=1e-5, rtol=1e-5)

    # Also exercise the stride > 1 path (wrapper-side de-interleave keeps all
    # in-kernel tap slices contiguous).
    fn2 = jax.jit(functools.partial(simulate_conv1d,
                                    kernel_size=kernel_size,
                                    stride=2, padding=0))
    out2 = fn2(x, params)
    jax.block_until_ready(out2)
    ref2 = _reference(x, params, kernel_size, 2, 0)
    assert out2.shape == ref2.shape
    assert jnp.allclose(out2, ref2, atol=1e-5, rtol=1e-5)

    print("KERNEL_OK")
</pallas_src>

<mosaic_0001>
module attributes {stable_mosaic.version = 11 : i64} {
  func.func @_conv_mlp_kernel(%arg0: i32, %arg1: memref<1x18x128xf32, #tpu.memory_space<vmem>>, %arg2: memref<3x32xf32, #tpu.memory_space<smem>>, %arg3: memref<32xf32, #tpu.memory_space<smem>>, %arg4: memref<32xf32, #tpu.memory_space<smem>>, %arg5: memref<1xf32, #tpu.memory_space<smem>>, %arg6: memref<16x128xf32, #tpu.memory_space<vmem>>) attributes {dimension_semantics = [#tpu.dimension_semantics<parallel>], iteration_bounds = array<i64: 1>, scalar_prefetch = 0 : i64, scratch_operands = 0 : i64, tpu.core_type = #tpu.core_type<tc>, window_params = [{transform_indices = @transform_0, window_bounds = array<i64: 1, 18, 128>}, {transform_indices = @transform_1, window_bounds = array<i64: 3, 32>}, {transform_indices = @transform_2, window_bounds = array<i64: 32>}, {transform_indices = @transform_3, window_bounds = array<i64: 32>}, {transform_indices = @transform_4, window_bounds = array<i64: 1>}, {transform_indices = @transform_5, window_bounds = array<i64: 16, 128>}]} {
    %c0 = arith.constant 0 : index
    %c0_0 = arith.constant 0 : index
    %c0_1 = arith.constant 0 : index
    %0 = vector.load %arg1[%c0, %c0_0, %c0_1] : memref<1x18x128xf32, #tpu.memory_space<vmem>>, vector<1x16x128xf32>
    %1 = vector.shape_cast %0 : vector<1x16x128xf32> to vector<16x128xf32>
    %c0_2 = arith.constant 0 : index
    %c1 = arith.constant 1 : index
    %c0_3 = arith.constant 0 : index
    %2 = vector.load %arg1[%c0_2, %c1, %c0_3] : memref<1x18x128xf32, #tpu.memory_space<vmem>>, vector<1x16x128xf32>
    %3 = vector.shape_cast %2 : vector<1x16x128xf32> to vector<16x128xf32>
    %c0_4 = arith.constant 0 : index
    %c2 = arith.constant 2 : index
    %c0_5 = arith.constant 0 : index
    %4 = vector.load %arg1[%c0_4, %c2, %c0_5] : memref<1x18x128xf32, #tpu.memory_space<vmem>>, vector<1x16x128xf32>
    %5 = vector.shape_cast %4 : vector<1x16x128xf32> to vector<16x128xf32>
    %cst = arith.constant 0.000000e+00 : f32
    %6 = vector.broadcast %cst : f32 to vector<16x128xf32>
    %c0_6 = arith.constant 0 : index
    %7 = memref.load %arg5[%c0_6] : memref<1xf32, #tpu.memory_space<smem>>
    %8 = vector.broadcast %7 : f32 to vector<16x128xf32>
    %9 = arith.addf %6, %8 : vector<16x128xf32>
    %c0_7 = arith.constant 0 : index
    %c0_8 = arith.constant 0 : index
    %10 = memref.load %arg2[%c0_7, %c0_8] : memref<3x32xf32, #tpu.memory_space<smem>>
    %11 = vector.broadcast %10 : f32 to vector<16x128xf32>
    %12 = arith.mulf %1, %11 : vector<16x128xf32>
    %c1_9 = arith.constant 1 : index
    %c0_10 = arith.constant 0 : index
    %13 = memref.load %arg2[%c1_9, %c0_10] : memref<3x32xf32, #tpu.memory_space<smem>>
    %14 = vector.broadcast %13 : f32 to vector<16x128xf32>
    %15 = arith.mulf %3, %14 : vector<16x128xf32>
    %16 = arith.addf %12, %15 : vector<16x128xf32>
    %c2_11 = arith.constant 2 : index
    %c0_12 = arith.constant 0 : index
    %17 = memref.load %arg2[%c2_11, %c0_12] : memref<3x32xf32, #tpu.memory_space<smem>>
    %18 = vector.broadcast %17 : f32 to vector<16x128xf32>
    %19 = arith.mulf %5, %18 : vector<16x128xf32>
    %20 = arith.addf %16, %19 : vector<16x128xf32>
    %c0_13 = arith.constant 0 : index
    %21 = memref.load %arg3[%c0_13] : memref<32xf32, #tpu.memory_space<smem>>
    %22 = vector.broadcast %21 : f32 to vector<16x128xf32>
    %23 = arith.addf %20, %22 : vector<16x128xf32>
    %cst_14 = arith.constant 0.000000e+00 : f32
    %24 = vector.broadcast %cst_14 : f32 to vector<16x128xf32>
    %25 = arith.maximumf %23, %24 : vector<16x128xf32>
    %c0_15 = arith.constant 0 : index
    %26 = memref.load %arg4[%c0_15] : memref<32xf32, #tpu.memory_space<smem>>
    %27 = vector.broadcast %26 : f32 to vector<16x128xf32>
    %28 = arith.mulf %25, %27 : vector<16x128xf32>
    %29 = arith.addf %9, %28 : vector<16x128xf32>
    %c0_16 = arith.constant 0 : index
    %c1_17 = arith.constant 1 : index
    %30 = memref.load %arg2[%c0_16, %c1_17] : memref<3x32xf32, #tpu.memory_space<smem>>
    %31 = vector.broadcast %30 : f32 to vector<16x128xf32>
    %32 = arith.mulf %1, %31 : vector<16x128xf32>
    %c1_18 = arith.constant 1 : index
    %c1_19 = arith.constant 1 : index
    %33 = memref.load %arg2[%c1_18, %c1_19] : memref<3x32xf32, #tpu.memory_space<smem>>
    %34 = vector.broadcast %33 : f32 to vector<16x128xf32>
    %35 = arith.mulf %3, %34 : vector<16x128xf32>
    %36 = arith.addf %32, %35 : vector<16x128xf32>
    %c2_20 = arith.constant 2 : index
    %c1_21 = arith.constant 1 : index
    %37 = memref.load %arg2[%c2_20, %c1_21] : memref<3x32xf32, #tpu.memory_space<smem>>
    %38 = vector.broadcast %37 : f32 to vector<16x128xf32>
    %39 = arith.mulf %5, %38 : vector<16x128xf32>
    %40 = arith.addf %36, %39 : vector<16x128xf32>
    %c1_22 = arith.constant 1 : index
    %41 = memref.load %arg3[%c1_22] : memref<32xf32, #tpu.memory_space<smem>>
    %42 = vector.broadcast %41 : f32 to vector<16x128xf32>
    %43 = arith.addf %40, %42 : vector<16x128xf32>
    %cst_23 = arith.constant 0.000000e+00 : f32
    %44 = vector.broadcast %cst_23 : f32 to vector<16x128xf32>
    %45 = arith.maximumf %43, %44 : vector<16x128xf32>
    %c1_24 = arith.constant 1 : index
    %46 = memref.load %arg4[%c1_24] : memref<32xf32, #tpu.memory_space<smem>>
    %47 = vector.broadcast %46 : f32 to vector<16x128xf32>
    %48 = arith.mulf %45, %47 : vector<16x128xf32>
    %49 = arith.addf %29, %48 : vector<16x128xf32>
    %c0_25 = arith.constant 0 : index
    %c2_26 = arith.constant 2 : index
    %50 = memref.load %arg2[%c0_25, %c2_26] : memref<3x32xf32, #tpu.memory_space<smem>>
    %51 = vector.broadcast %50 : f32 to vector<16x128xf32>
    %52 = arith.mulf %1, %51 : vector<16x128xf32>
    %c1_27 = arith.constant 1 : index
    %c2_28 = arith.constant 2 : index
    %53 = memref.load %arg2[%c1_27, %c2_28] : memref<3x32xf32, #tpu.memory_space<smem>>
    %54 = vector.broadcast %53 : f32 to vector<16x128xf32>
    %55 = arith.mulf %3, %54 : vector<16x128xf32>
    %56 = arith.addf %52, %55 : vector<16x128xf32>
    %c2_29 = arith.constant 2 : index
    %c2_30 = arith.constant 2 : index
    %57 = memref.load %arg2[%c2_29, %c2_30] : memref<3x32xf32, #tpu.memory_space<smem>>
    %58 = vector.broadcast %57 : f32 to vector<16x128xf32>
    %59 = arith.mulf %5, %58 : vector<16x128xf32>
    %60 = arith.addf %56, %59 : vector<16x128xf32>
    %c2_31 = arith.constant 2 : index
    %61 = memref.load %arg3[%c2_31] : memref<32xf32, #tpu.memory_space<smem>>
    %62 = vector.broadcast %61 : f32 to vector<16x128xf32>
    %63 = arith.addf %60, %62 : vector<16x128xf32>
    %cst_32 = arith.constant 0.000000e+00 : f32
    %64 = vector.broadcast %cst_32 : f32 to vector<16x128xf32>
    %65 = arith.maximumf %63, %64 : vector<16x128xf32>
    %c2_33 = arith.constant 2 : index
    %66 = memref.load %arg4[%c2_33] : memref<32xf32, #tpu.memory_space<smem>>
    %67 = vector.broadcast %66 : f32 to vector<16x128xf32>
    %68 = arith.mulf %65, %67 : vector<16x128xf32>
    %69 = arith.addf %49, %68 : vector<16x128xf32>
    %c0_34 = arith.constant 0 : index
    %c3 = arith.constant 3 : index
    %70 = memref.load %arg2[%c0_34, %c3] : memref<3x32xf32, #tpu.memory_space<smem>>
    %71 = vector.broadcast %70 : f32 to vector<16x128xf32>
    %72 = arith.mulf %1, %71 : vector<16x128xf32>
    %c1_35 = arith.constant 1 : index
    %c3_36 = arith.constant 3 : index
    %73 = memref.load %arg2[%c1_35, %c3_36] : memref<3x32xf32, #tpu.memory_space<smem>>
    %74 = vector.broadcast %73 : f32 to vector<16x128xf32>
    %75 = arith.mulf %3, %74 : vector<16x128xf32>
    %76 = arith.addf %72, %75 : vector<16x128xf32>
    %c2_37 = arith.constant 2 : index
    %c3_38 = arith.constant 3 : index
    %77 = memref.load %arg2[%c2_37, %c3_38] : memref<3x32xf32, #tpu.memory_space<smem>>
    %78 = vector.broadcast %77 : f32 to vector<16x128xf32>
    %79 = arith.mulf %5, %78 : vector<16x128xf32>
    %80 = arith.addf %76, %79 : vector<16x128xf32>
    %c3_39 = arith.constant 3 : index
    %81 = memref.load %arg3[%c3_39] : memref<32xf32, #tpu.memory_space<smem>>
    %82 = vector.broadcast %81 : f32 to vector<16x128xf32>
    %83 = arith.addf %80, %82 : vector<16x128xf32>
    %cst_40 = arith.constant 0.000000e+00 : f32
    %84 = vector.broadcast %cst_40 : f32 to vector<16x128xf32>
    %85 = arith.maximumf %83, %84 : vector<16x128xf32>
    %c3_41 = arith.constant 3 : index
    %86 = memref.load %arg4[%c3_41] : memref<32xf32, #tpu.memory_space<smem>>
    %87 = vector.broadcast %86 : f32 to vector<16x128xf32>
    %88 = arith.mulf %85, %87 : vector<16x128xf32>
    %89 = arith.addf %69, %88 : vector<16x128xf32>
    %c0_42 = arith.constant 0 : index
    %c4 = arith.constant 4 : index
    %90 = memref.load %arg2[%c0_42, %c4] : memref<3x32xf32, #tpu.memory_space<smem>>
    %91 = vector.broadcast %90 : f32 to vector<16x128xf32>
    %92 = arith.mulf %1, %91 : vector<16x128xf32>
    %c1_43 = arith.constant 1 : index
    %c4_44 = arith.constant 4 : index
    %93 = memref.load %arg2[%c1_43, %c4_44] : memref<3x32xf32, #tpu.memory_space<smem>>
    %94 = vector.broadcast %93 : f32 to vector<16x128xf32>
    %95 = arith.mulf %3, %94 : vector<16x128xf32>
    %96 = arith.addf %92, %95 : vector<16x128xf32>
    %c2_45 = arith.constant 2 : index
    %c4_46 = arith.constant 4 : index
    %97 = memref.load %arg2[%c2_45, %c4_46] : memref<3x32xf32, #tpu.memory_space<smem>>
    %98 = vector.broadcast %97 : f32 to vector<16x128xf32>
    %99 = arith.mulf %5, %98 : vector<16x128xf32>
    %100 = arith.addf %96, %99 : vector<16x128xf32>
    %c4_47 = arith.constant 4 : index
    %101 = memref.load %arg3[%c4_47] : memref<32xf32, #tpu.memory_space<smem>>
    %102 = vector.broadcast %101 : f32 to vector<16x128xf32>
    %103 = arith.addf %100, %102 : vector<16x128xf32>
    %cst_48 = arith.constant 0.000000e+00 : f32
    %104 = vector.broadcast %cst_48 : f32 to vector<16x128xf32>
    %105 = arith.maximumf %103, %104 : vector<16x128xf32>
    %c4_49 = arith.constant 4 : index
    %106 = memref.load %arg4[%c4_49] : memref<32xf32, #tpu.memory_space<smem>>
    %107 = vector.broadcast %106 : f32 to vector<16x128xf32>
    %108 = arith.mulf %105, %107 : vector<16x128xf32>
    %109 = arith.addf %89, %108 : vector<16x128xf32>
    %c0_50 = arith.constant 0 : index
    %c5 = arith.constant 5 : index
    %110 = memref.load %arg2[%c0_50, %c5] : memref<3x32xf32, #tpu.memory_space<smem>>
    %111 = vector.broadcast %110 : f32 to vector<16x128xf32>
    %112 = arith.mulf %1, %111 : vector<16x128xf32>
    %c1_51 = arith.constant 1 : index
    %c5_52 = arith.constant 5 : index
    %113 = memref.load %arg2[%c1_51, %c5_52] : memref<3x32xf32, #tpu.memory_space<smem>>
    %114 = vector.broadcast %113 : f32 to vector<16x128xf32>
    %115 = arith.mulf %3, %114 : vector<16x128xf32>
    %116 = arith.addf %112, %115 : vector<16x128xf32>
    %c2_53 = arith.constant 2 : index
    %c5_54 = arith.constant 5 : index
    %117 = memref.load %arg2[%c2_53, %c5_54] : memref<3x32xf32, #tpu.memory_space<smem>>
    %118 = vector.broadcast %117 : f32 to vector<16x128xf32>
    %119 = arith.mulf %5, %118 : vector<16x128xf32>
    %120 = arith.addf %116, %119 : vector<16x128xf32>
    %c5_55 = arith.constant 5 : index
    %121 = memref.load %arg3[%c5_55] : memref<32xf32, #tpu.memory_space<smem>>
    %122 = vector.broadcast %121 : f32 to vector<16x128xf32>
    %123 = arith.addf %120, %122 : vector<16x128xf32>
    %cst_56 = arith.constant 0.000000e+00 : f32
    %124 = vector.broadcast %cst_56 : f32 to vector<16x128xf32>
    %125 = arith.maximumf %123, %124 : vector<16x128xf32>
    %c5_57 = arith.constant 5 : index
    %126 = memref.load %arg4[%c5_57] : memref<32xf32, #tpu.memory_space<smem>>
    %127 = vector.broadcast %126 : f32 to vector<16x128xf32>
    %128 = arith.mulf %125, %127 : vector<16x128xf32>
    %129 = arith.addf %109, %128 : vector<16x128xf32>
    %c0_58 = arith.constant 0 : index
    %c6 = arith.constant 6 : index
    %130 = memref.load %arg2[%c0_58, %c6] : memref<3x32xf32, #tpu.memory_space<smem>>
    %131 = vector.broadcast %130 : f32 to vector<16x128xf32>
    %132 = arith.mulf %1, %131 : vector<16x128xf32>
    %c1_59 = arith.constant 1 : index
    %c6_60 = arith.constant 6 : index
    %133 = memref.load %arg2[%c1_59, %c6_60] : memref<3x32xf32, #tpu.memory_space<smem>>
    %134 = vector.broadcast %133 : f32 to vector<16x128xf32>
    %135 = arith.mulf %3, %134 : vector<16x128xf32>
    %136 = arith.addf %132, %135 : vector<16x128xf32>
    %c2_61 = arith.constant 2 : index
    %c6_62 = arith.constant 6 : index
    %137 = memref.load %arg2[%c2_61, %c6_62] : memref<3x32xf32, #tpu.memory_space<smem>>
    %138 = vector.broadcast %137 : f32 to vector<16x128xf32>
    %139 = arith.mulf %5, %138 : vector<16x128xf32>
    %140 = arith.addf %136, %139 : vector<16x128xf32>
    %c6_63 = arith.constant 6 : index
    %141 = memref.load %arg3[%c6_63] : memref<32xf32, #tpu.memory_space<smem>>
    %142 = vector.broadcast %141 : f32 to vector<16x128xf32>
    %143 = arith.addf %140, %142 : vector<16x128xf32>
    %cst_64 = arith.constant 0.000000e+00 : f32
    %144 = vector.broadcast %cst_64 : f32 to vector<16x128xf32>
    %145 = arith.maximumf %143, %144 : vector<16x128xf32>
    %c6_65 = arith.constant 6 : index
    %146 = memref.load %arg4[%c6_65] : memref<32xf32, #tpu.memory_space<smem>>
    %147 = vector.broadcast %146 : f32 to vector<16x128xf32>
    %148 = arith.mulf %145, %147 : vector<16x128xf32>
    %149 = arith.addf %129, %148 : vector<16x128xf32>
    %c0_66 = arith.constant 0 : index
    %c7 = arith.constant 7 : index
    %150 = memref.load %arg2[%c0_66, %c7] : memref<3x32xf32, #tpu.memory_space<smem>>
    %151 = vector.broadcast %150 : f32 to vector<16x128xf32>
    %152 = arith.mulf %1, %151 : vector<16x128xf32>
    %c1_67 = arith.constant 1 : index
    %c7_68 = arith.constant 7 : index
    %153 = memref.load %arg2[%c1_67, %c7_68] : memref<3x32xf32, #tpu.memory_space<smem>>
    %154 = vector.broadcast %153 : f32 to vector<16x128xf32>
    %155 = arith.mulf %3, %154 : vector<16x128xf32>
    %156 = arith.addf %152, %155 : vector<16x128xf32>
    %c2_69 = arith.constant 2 : index
    %c7_70 = arith.constant 7 : index
    %157 = memref.load %arg2[%c2_69, %c7_70] : memref<3x32xf32, #tpu.memory_space<smem>>
    %158 = vector.broadcast %157 : f32 to vector<16x128xf32>
    %159 = arith.mulf %5, %158 : vector<16x128xf32>
    %160 = arith.addf %156, %159 : vector<16x128xf32>
    %c7_71 = arith.constant 7 : index
    %161 = memref.load %arg3[%c7_71] : memref<32xf32, #tpu.memory_space<smem>>
    %162 = vector.broadcast %161 : f32 to vector<16x128xf32>
    %163 = arith.addf %160, %162 : vector<16x128xf32>
    %cst_72 = arith.constant 0.000000e+00 : f32
    %164 = vector.broadcast %cst_72 : f32 to vector<16x128xf32>
    %165 = arith.maximumf %163, %164 : vector<16x128xf32>
    %c7_73 = arith.constant 7 : index
    %166 = memref.load %arg4[%c7_73] : memref<32xf32, #tpu.memory_space<smem>>
    %167 = vector.broadcast %166 : f32 to vector<16x128xf32>
    %168 = arith.mulf %165, %167 : vector<16x128xf32>
    %169 = arith.addf %149, %168 : vector<16x128xf32>
    %c0_74 = arith.constant 0 : index
    %c8 = arith.constant 8 : index
    %170 = memref.load %arg2[%c0_74, %c8] : memref<3x32xf32, #tpu.memory_space<smem>>
    %171 = vector.broadcast %170 : f32 to vector<16x128xf32>
    %172 = arith.mulf %1, %171 : vector<16x128xf32>
    %c1_75 = arith.constant 1 : index
    %c8_76 = arith.constant 8 : index
    %173 = memref.load %arg2[%c1_75, %c8_76] : memref<3x32xf32, #tpu.memory_space<smem>>
    %174 = vector.broadcast %173 : f32 to vector<16x128xf32>
    %175 = arith.mulf %3, %174 : vector<16x128xf32>
    %176 = arith.addf %172, %175 : vector<16x128xf32>
    %c2_77 = arith.constant 2 : index
    %c8_78 = arith.constant 8 : index
    %177 = memref.load %arg2[%c2_77, %c8_78] : memref<3x32xf32, #tpu.memory_space<smem>>
    %178 = vector.broadcast %177 : f32 to vector<16x128xf32>
    %179 = arith.mulf %5, %178 : vector<16x128xf32>
    %180 = arith.addf %176, %179 : vector<16x128xf32>
    %c8_79 = arith.constant 8 : index
    %181 = memref.load %arg3[%c8_79] : memref<32xf32, #tpu.memory_space<smem>>
    %182 = vector.broadcast %181 : f32 to vector<16x128xf32>
    %183 = arith.addf %180, %182 : vector<16x128xf32>
    %cst_80 = arith.constant 0.000000e+00 : f32
    %184 = vector.broadcast %cst_80 : f32 to vector<16x128xf32>
    %185 = arith.maximumf %183, %184 : vector<16x128xf32>
    %c8_81 = arith.constant 8 : index
    %186 = memref.load %arg4[%c8_81] : memref<32xf32, #tpu.memory_space<smem>>
    %187 = vector.broadcast %186 : f32 to vector<16x128xf32>
    %188 = arith.mulf %185, %187 : vector<16x128xf32>
    %189 = arith.addf %169, %188 : vector<16x128xf32>
    %c0_82 = arith.constant 0 : index
    %c9 = arith.constant 9 : index
    %190 = memref.load %arg2[%c0_82, %c9] : memref<3x32xf32, #tpu.memory_space<smem>>
    %191 = vector.broadcast %190 : f32 to vector<16x128xf32>
    %192 = arith.mulf %1, %191 : vector<16x128xf32>
    %c1_83 = arith.constant 1 : index
    %c9_84 = arith.constant 9 : index
    %193 = memref.load %arg2[%c1_83, %c9_84] : memref<3x32xf32, #tpu.memory_space<smem>>
    %194 = vector.broadcast %193 : f32 to vector<16x128xf32>
    %195 = arith.mulf %3, %194 : vector<16x128xf32>
    %196 = arith.addf %192, %195 : vector<16x128xf32>
    %c2_85 = arith.constant 2 : index
    %c9_86 = arith.constant 9 : index
    %197 = memref.load %arg2[%c2_85, %c9_86] : memref<3x32xf32, #tpu.memory_space<smem>>
    %198 = vector.broadcast %197 : f32 to vector<16x128xf32>
    %199 = arith.mulf %5, %198 : vector<16x128xf32>
    %200 = arith.addf %196, %199 : vector<16x128xf32>
    %c9_87 = arith.constant 9 : index
    %201 = memref.load %arg3[%c9_87] : memref<32xf32, #tpu.memory_space<smem>>
    %202 = vector.broadcast %201 : f32 to vector<16x128xf32>
    %203 = arith.addf %200, %202 : vector<16x128xf32>
    %cst_88 = arith.constant 0.000000e+00 : f32
    %204 = vector.broadcast %cst_88 : f32 to vector<16x128xf32>
    %205 = arith.maximumf %203, %204 : vector<16x128xf32>
    %c9_89 = arith.constant 9 : index
    %206 = memref.load %arg4[%c9_89] : memref<32xf32, #tpu.memory_space<smem>>
    %207 = vector.broadcast %206 : f32 to vector<16x128xf32>
    %208 = arith.mulf %205, %207 : vector<16x128xf32>
    %209 = arith.addf %189, %208 : vector<16x128xf32>
    %c0_90 = arith.constant 0 : index
    %c10 = arith.constant 10 : index
    %210 = memref.load %arg2[%c0_90, %c10] : memref<3x32xf32, #tpu.memory_space<smem>>
    %211 = vector.broadcast %210 : f32 to vector<16x128xf32>
    %212 = arith.mulf %1, %211 : vector<16x128xf32>
    %c1_91 = arith.constant 1 : index
    %c10_92 = arith.constant 10 : index
    %213 = memref.load %arg2[%c1_91, %c10_92] : memref<3x32xf32, #tpu.memory_space<smem>>
    %214 = vector.broadcast %213 : f32 to vector<16x128xf32>
    %215 = arith.mulf %3, %214 : vector<16x128xf32>
    %216 = arith.addf %212, %215 : vector<16x128xf32>
    %c2_93 = arith.constant 2 : index
    %c10_94 = arith.constant 10 : index
    %217 = memref.load %arg2[%c2_93, %c10_94] : memref<3x32xf32, #tpu.memory_space<smem>>
    %218 = vector.broadcast %217 : f32 to vector<16x128xf32>
    %219 = arith.mulf %5, %218 : vector<16x128xf32>
    %220 = arith.addf %216, %219 : vector<16x128xf32>
    %c10_95 = arith.constant 10 : index
    %221 = memref.load %arg3[%c10_95] : memref<32xf32, #tpu.memory_space<smem>>
    %222 = vector.broadcast %221 : f32 to vector<16x128xf32>
    %223 = arith.addf %220, %222 : vector<16x128xf32>
    %cst_96 = arith.constant 0.000000e+00 : f32
    %224 = vector.broadcast %cst_96 : f32 to vector<16x128xf32>
    %225 = arith.maximumf %223, %224 : vector<16x128xf32>
    %c10_97 = arith.constant 10 : index
    %226 = memref.load %arg4[%c10_97] : memref<32xf32, #tpu.memory_space<smem>>
    %227 = vector.broadcast %226 : f32 to vector<16x128xf32>
    %228 = arith.mulf %225, %227 : vector<16x128xf32>
    %229 = arith.addf %209, %228 : vector<16x128xf32>
    %c0_98 = arith.constant 0 : index
    %c11 = arith.constant 11 : index
    %230 = memref.load %arg2[%c0_98, %c11] : memref<3x32xf32, #tpu.memory_space<smem>>
    %231 = vector.broadcast %230 : f32 to vector<16x128xf32>
    %232 = arith.mulf %1, %231 : vector<16x128xf32>
    %c1_99 = arith.constant 1 : index
    %c11_100 = arith.constant 11 : index
    %233 = memref.load %arg2[%c1_99, %c11_100] : memref<3x32xf32, #tpu.memory_space<smem>>
    %234 = vector.broadcast %233 : f32 to vector<16x128xf32>
    %235 = arith.mulf %3, %234 : vector<16x128xf32>
    %236 = arith.addf %232, %235 : vector<16x128xf32>
    %c2_101 = arith.constant 2 : index
    %c11_102 = arith.constant 11 : index
    %237 = memref.load %arg2[%c2_101, %c11_102] : memref<3x32xf32, #tpu.memory_space<smem>>
    %238 = vector.broadcast %237 : f32 to vector<16x128xf32>
    %239 = arith.mulf %5, %238 : vector<16x128xf32>
    %240 = arith.addf %236, %239 : vector<16x128xf32>
    %c11_103 = arith.constant 11 : index
    %241 = memref.load %arg3[%c11_103] : memref<32xf32, #tpu.memory_space<smem>>
    %242 = vector.broadcast %241 : f32 to vector<16x128xf32>
    %243 = arith.addf %240, %242 : vector<16x128xf32>
    %cst_104 = arith.constant 0.000000e+00 : f32
    %244 = vector.broadcast %cst_104 : f32 to vector<16x128xf32>
    %245 = arith.maximumf %243, %244 : vector<16x128xf32>
    %c11_105 = arith.constant 11 : index
    %246 = memref.load %arg4[%c11_105] : memref<32xf32, #tpu.memory_space<smem>>
    %247 = vector.broadcast %246 : f32 to vector<16x128xf32>
    %248 = arith.mulf %245, %247 : vector<16x128xf32>
    %249 = arith.addf %229, %248 : vector<16x128xf32>
    %c0_106 = arith.constant 0 : index
    %c12 = arith.constant 12 : index
    %250 = memref.load %arg2[%c0_106, %c12] : memref<3x32xf32, #tpu.memory_space<smem>>
    %251 = vector.broadcast %250 : f32 to vector<16x128xf32>
    %252 = arith.mulf %1, %251 : vector<16x128xf32>
    %c1_107 = arith.constant 1 : index
    %c12_108 = arith.constant 12 : index
    %253 = memref.load %arg2[%c1_107, %c12_108] : memref<3x32xf32, #tpu.memory_space<smem>>
    %254 = vector.broadcast %253 : f32 to vector<16x128xf32>
    %255 = arith.mulf %3, %254 : vector<16x128xf32>
    %256 = arith.addf %252, %255 : vector<16x128xf32>
    %c2_109 = arith.constant 2 : index
    %c12_110 = arith.constant 12 : index
    %257 = memref.load %arg2[%c2_109, %c12_110] : memref<3x32xf32, #tpu.memory_space<smem>>
    %258 = vector.broadcast %257 : f32 to vector<16x128xf32>
    %259 = arith.mulf %5, %258 : vector<16x128xf32>
    %260 = arith.addf %256, %259 : vector<16x128xf32>
    %c12_111 = arith.constant 12 : index
    %261 = memref.load %arg3[%c12_111] : memref<32xf32, #tpu.memory_space<smem>>
    %262 = vector.broadcast %261 : f32 to vector<16x128xf32>
    %263 = arith.addf %260, %262 : vector<16x128xf32>
    %cst_112 = arith.constant 0.000000e+00 : f32
    %264 = vector.broadcast %cst_112 : f32 to vector<16x128xf32>
    %265 = arith.maximumf %263, %264 : vector<16x128xf32>
    %c12_113 = arith.constant 12 : index
    %266 = memref.load %arg4[%c12_113] : memref<32xf32, #tpu.memory_space<smem>>
    %267 = vector.broadcast %266 : f32 to vector<16x128xf32>
    %268 = arith.mulf %265, %267 : vector<16x128xf32>
    %269 = arith.addf %249, %268 : vector<16x128xf32>
    %c0_114 = arith.constant 0 : index
    %c13 = arith.constant 13 : index
    %270 = memref.load %arg2[%c0_114, %c13] : memref<3x32xf32, #tpu.memory_space<smem>>
    %271 = vector.broadcast %270 : f32 to vector<16x128xf32>
    %272 = arith.mulf %1, %271 : vector<16x128xf32>
    %c1_115 = arith.constant 1 : index
    %c13_116 = arith.constant 13 : index
    %273 = memref.load %arg2[%c1_115, %c13_116] : memref<3x32xf32, #tpu.memory_space<smem>>
    %274 = vector.broadcast %273 : f32 to vector<16x128xf32>
    %275 = arith.mulf %3, %274 : vector<16x128xf32>
    %276 = arith.addf %272, %275 : vector<16x128xf32>
    %c2_117 = arith.constant 2 : index
    %c13_118 = arith.constant 13 : index
    %277 = memref.load %arg2[%c2_117, %c13_118] : memref<3x32xf32, #tpu.memory_space<smem>>
    %278 = vector.broadcast %277 : f32 to vector<16x128xf32>
    %279 = arith.mulf %5, %278 : vector<16x128xf32>
    %280 = arith.addf %276, %279 : vector<16x128xf32>
    %c13_119 = arith.constant 13 : index
    %281 = memref.load %arg3[%c13_119] : memref<32xf32, #tpu.memory_space<smem>>
    %282 = vector.broadcast %281 : f32 to vector<16x128xf32>
    %283 = arith.addf %280, %282 : vector<16x128xf32>
    %cst_120 = arith.constant 0.000000e+00 : f32
    %284 = vector.broadcast %cst_120 : f32 to vector<16x128xf32>
    %285 = arith.maximumf %283, %284 : vector<16x128xf32>
    %c13_121 = arith.constant 13 : index
    %286 = memref.load %arg4[%c13_121] : memref<32xf32, #tpu.memory_space<smem>>
    %287 = vector.broadcast %286 : f32 to vector<16x128xf32>
    %288 = arith.mulf %285, %287 : vector<16x128xf32>
    %289 = arith.addf %269, %288 : vector<16x128xf32>
    %c0_122 = arith.constant 0 : index
    %c14 = arith.constant 14 : index
    %290 = memref.load %arg2[%c0_122, %c14] : memref<3x32xf32, #tpu.memory_space<smem>>
    %291 = vector.broadcast %290 : f32 to vector<16x128xf32>
    %292 = arith.mulf %1, %291 : vector<16x128xf32>
    %c1_123 = arith.constant 1 : index
    %c14_124 = arith.constant 14 : index
    %293 = memref.load %arg2[%c1_123, %c14_124] : memref<3x32xf32, #tpu.memory_space<smem>>
    %294 = vector.broadcast %293 : f32 to vector<16x128xf32>
    %295 = arith.mulf %3, %294 : vector<16x128xf32>
    %296 = arith.addf %292, %295 : vector<16x128xf32>
    %c2_125 = arith.constant 2 : index
    %c14_126 = arith.constant 14 : index
    %297 = memref.load %arg2[%c2_125, %c14_126] : memref<3x32xf32, #tpu.memory_space<smem>>
    %298 = vector.broadcast %297 : f32 to vector<16x128xf32>
    %299 = arith.mulf %5, %298 : vector<16x128xf32>
    %300 = arith.addf %296, %299 : vector<16x128xf32>
    %c14_127 = arith.constant 14 : index
    %301 = memref.load %arg3[%c14_127] : memref<32xf32, #tpu.memory_space<smem>>
    %302 = vector.broadcast %301 : f32 to vector<16x128xf32>
    %303 = arith.addf %300, %302 : vector<16x128xf32>
    %cst_128 = arith.constant 0.000000e+00 : f32
    %304 = vector.broadcast %cst_128 : f32 to vector<16x128xf32>
    %305 = arith.maximumf %303, %304 : vector<16x128xf32>
    %c14_129 = arith.constant 14 : index
    %306 = memref.load %arg4[%c14_129] : memref<32xf32, #tpu.memory_space<smem>>
    %307 = vector.broadcast %306 : f32 to vector<16x128xf32>
    %308 = arith.mulf %305, %307 : vector<16x128xf32>
    %309 = arith.addf %289, %308 : vector<16x128xf32>
    %c0_130 = arith.constant 0 : index
    %c15 = arith.constant 15 : index
    %310 = memref.load %arg2[%c0_130, %c15] : memref<3x32xf32, #tpu.memory_space<smem>>
    %311 = vector.broadcast %310 : f32 to vector<16x128xf32>
    %312 = arith.mulf %1, %311 : vector<16x128xf32>
    %c1_131 = arith.constant 1 : index
    %c15_132 = arith.constant 15 : index
    %313 = memref.load %arg2[%c1_131, %c15_132] : memref<3x32xf32, #tpu.memory_space<smem>>
    %314 = vector.broadcast %313 : f32 to vector<16x128xf32>
    %315 = arith.mulf %3, %314 : vector<16x128xf32>
    %316 = arith.addf %312, %315 : vector<16x128xf32>
    %c2_133 = arith.constant 2 : index
    %c15_134 = arith.constant 15 : index
    %317 = memref.load %arg2[%c2_133, %c15_134] : memref<3x32xf32, #tpu.memory_space<smem>>
    %318 = vector.broadcast %317 : f32 to vector<16x128xf32>
    %319 = arith.mulf %5, %318 : vector<16x128xf32>
    %320 = arith.addf %316, %319 : vector<16x128xf32>
    %c15_135 = arith.constant 15 : index
    %321 = memref.load %arg3[%c15_135] : memref<32xf32, #tpu.memory_space<smem>>
    %322 = vector.broadcast %321 : f32 to vector<16x128xf32>
    %323 = arith.addf %320, %322 : vector<16x128xf32>
    %cst_136 = arith.constant 0.000000e+00 : f32
    %324 = vector.broadcast %cst_136 : f32 to vector<16x128xf32>
    %325 = arith.maximumf %323, %324 : vector<16x128xf32>
    %c15_137 = arith.constant 15 : index
    %326 = memref.load %arg4[%c15_137] : memref<32xf32, #tpu.memory_space<smem>>
    %327 = vector.broadcast %326 : f32 to vector<16x128xf32>
    %328 = arith.mulf %325, %327 : vector<16x128xf32>
    %329 = arith.addf %309, %328 : vector<16x128xf32>
    %c0_138 = arith.constant 0 : index
    %c16 = arith.constant 16 : index
    %330 = memref.load %arg2[%c0_138, %c16] : memref<3x32xf32, #tpu.memory_space<smem>>
    %331 = vector.broadcast %330 : f32 to vector<16x128xf32>
    %332 = arith.mulf %1, %331 : vector<16x128xf32>
    %c1_139 = arith.constant 1 : index
    %c16_140 = arith.constant 16 : index
    %333 = memref.load %arg2[%c1_139, %c16_140] : memref<3x32xf32, #tpu.memory_space<smem>>
    %334 = vector.broadcast %333 : f32 to vector<16x128xf32>
    %335 = arith.mulf %3, %334 : vector<16x128xf32>
    %336 = arith.addf %332, %335 : vector<16x128xf32>
    %c2_141 = arith.constant 2 : index
    %c16_142 = arith.constant 16 : index
    %337 = memref.load %arg2[%c2_141, %c16_142] : memref<3x32xf32, #tpu.memory_space<smem>>
    %338 = vector.broadcast %337 : f32 to vector<16x128xf32>
    %339 = arith.mulf %5, %338 : vector<16x128xf32>
    %340 = arith.addf %336, %339 : vector<16x128xf32>
    %c16_143 = arith.constant 16 : index
    %341 = memref.load %arg3[%c16_143] : memref<32xf32, #tpu.memory_space<smem>>
    %342 = vector.broadcast %341 : f32 to vector<16x128xf32>
    %343 = arith.addf %340, %342 : vector<16x128xf32>
    %cst_144 = arith.constant 0.000000e+00 : f32
    %344 = vector.broadcast %cst_144 : f32 to vector<16x128xf32>
    %345 = arith.maximumf %343, %344 : vector<16x128xf32>
    %c16_145 = arith.constant 16 : index
    %346 = memref.load %arg4[%c16_145] : memref<32xf32, #tpu.memory_space<smem>>
    %347 = vector.broadcast %346 : f32 to vector<16x128xf32>
    %348 = arith.mulf %345, %347 : vector<16x128xf32>
    %349 = arith.addf %329, %348 : vector<16x128xf32>
    %c0_146 = arith.constant 0 : index
    %c17 = arith.constant 17 : index
    %350 = memref.load %arg2[%c0_146, %c17] : memref<3x32xf32, #tpu.memory_space<smem>>
    %351 = vector.broadcast %350 : f32 to vector<16x128xf32>
    %352 = arith.mulf %1, %351 : vector<16x128xf32>
    %c1_147 = arith.constant 1 : index
    %c17_148 = arith.constant 17 : index
    %353 = memref.load %arg2[%c1_147, %c17_148] : memref<3x32xf32, #tpu.memory_space<smem>>
    %354 = vector.broadcast %353 : f32 to vector<16x128xf32>
    %355 = arith.mulf %3, %354 : vector<16x128xf32>
    %356 = arith.addf %352, %355 : vector<16x128xf32>
    %c2_149 = arith.constant 2 : index
    %c17_150 = arith.constant 17 : index
    %357 = memref.load %arg2[%c2_149, %c17_150] : memref<3x32xf32, #tpu.memory_space<smem>>
    %358 = vector.broadcast %357 : f32 to vector<16x128xf32>
    %359 = arith.mulf %5, %358 : vector<16x128xf32>
    %360 = arith.addf %356, %359 : vector<16x128xf32>
    %c17_151 = arith.constant 17 : index
    %361 = memref.load %arg3[%c17_151] : memref<32xf32, #tpu.memory_space<smem>>
    %362 = vector.broadcast %361 : f32 to vector<16x128xf32>
    %363 = arith.addf %360, %362 : vector<16x128xf32>
    %cst_152 = arith.constant 0.000000e+00 : f32
    %364 = vector.broadcast %cst_152 : f32 to vector<16x128xf32>
    %365 = arith.maximumf %363, %364 : vector<16x128xf32>
    %c17_153 = arith.constant 17 : index
    %366 = memref.load %arg4[%c17_153] : memref<32xf32, #tpu.memory_space<smem>>
    %367 = vector.broadcast %366 : f32 to vector<16x128xf32>
    %368 = arith.mulf %365, %367 : vector<16x128xf32>
    %369 = arith.addf %349, %368 : vector<16x128xf32>
    %c0_154 = arith.constant 0 : index
    %c18 = arith.constant 18 : index
    %370 = memref.load %arg2[%c0_154, %c18] : memref<3x32xf32, #tpu.memory_space<smem>>
    %371 = vector.broadcast %370 : f32 to vector<16x128xf32>
    %372 = arith.mulf %1, %371 : vector<16x128xf32>
    %c1_155 = arith.constant 1 : index
    %c18_156 = arith.constant 18 : index
    %373 = memref.load %arg2[%c1_155, %c18_156] : memref<3x32xf32, #tpu.memory_space<smem>>
    %374 = vector.broadcast %373 : f32 to vector<16x128xf32>
    %375 = arith.mulf %3, %374 : vector<16x128xf32>
    %376 = arith.addf %372, %375 : vector<16x128xf32>
    %c2_157 = arith.constant 2 : index
    %c18_158 = arith.constant 18 : index
    %377 = memref.load %arg2[%c2_157, %c18_158] : memref<3x32xf32, #tpu.memory_space<smem>>
    %378 = vector.broadcast %377 : f32 to vector<16x128xf32>
    %379 = arith.mulf %5, %378 : vector<16x128xf32>
    %380 = arith.addf %376, %379 : vector<16x128xf32>
    %c18_159 = arith.constant 18 : index
    %381 = memref.load %arg3[%c18_159] : memref<32xf32, #tpu.memory_space<smem>>
    %382 = vector.broadcast %381 : f32 to vector<16x128xf32>
    %383 = arith.addf %380, %382 : vector<16x128xf32>
    %cst_160 = arith.constant 0.000000e+00 : f32
    %384 = vector.broadcast %cst_160 : f32 to vector<16x128xf32>
    %385 = arith.maximumf %383, %384 : vector<16x128xf32>
    %c18_161 = arith.constant 18 : index
    %386 = memref.load %arg4[%c18_161] : memref<32xf32, #tpu.memory_space<smem>>
    %387 = vector.broadcast %386 : f32 to vector<16x128xf32>
    %388 = arith.mulf %385, %387 : vector<16x128xf32>
    %389 = arith.addf %369, %388 : vector<16x128xf32>
    %c0_162 = arith.constant 0 : index
    %c19 = arith.constant 19 : index
    %390 = memref.load %arg2[%c0_162, %c19] : memref<3x32xf32, #tpu.memory_space<smem>>
    %391 = vector.broadcast %390 : f32 to vector<16x128xf32>
    %392 = arith.mulf %1, %391 : vector<16x128xf32>
    %c1_163 = arith.constant 1 : index
    %c19_164 = arith.constant 19 : index
    %393 = memref.load %arg2[%c1_163, %c19_164] : memref<3x32xf32, #tpu.memory_space<smem>>
    %394 = vector.broadcast %393 : f32 to vector<16x128xf32>
    %395 = arith.mulf %3, %394 : vector<16x128xf32>
    %396 = arith.addf %392, %395 : vector<16x128xf32>
    %c2_165 = arith.constant 2 : index
    %c19_166 = arith.constant 19 : index
    %397 = memref.load %arg2[%c2_165, %c19_166] : memref<3x32xf32, #tpu.memory_space<smem>>
    %398 = vector.broadcast %397 : f32 to vector<16x128xf32>
    %399 = arith.mulf %5, %398 : vector<16x128xf32>
    %400 = arith.addf %396, %399 : vector<16x128xf32>
    %c19_167 = arith.constant 19 : index
    %401 = memref.load %arg3[%c19_167] : memref<32xf32, #tpu.memory_space<smem>>
    %402 = vector.broadcast %401 : f32 to vector<16x128xf32>
    %403 = arith.addf %400, %402 : vector<16x128xf32>
    %cst_168 = arith.constant 0.000000e+00 : f32
    %404 = vector.broadcast %cst_168 : f32 to vector<16x128xf32>
    %405 = arith.maximumf %403, %404 : vector<16x128xf32>
    %c19_169 = arith.constant 19 : index
    %406 = memref.load %arg4[%c19_169] : memref<32xf32, #tpu.memory_space<smem>>
    %407 = vector.broadcast %406 : f32 to vector<16x128xf32>
    %408 = arith.mulf %405, %407 : vector<16x128xf32>
    %409 = arith.addf %389, %408 : vector<16x128xf32>
    %c0_170 = arith.constant 0 : index
    %c20 = arith.constant 20 : index
    %410 = memref.load %arg2[%c0_170, %c20] : memref<3x32xf32, #tpu.memory_space<smem>>
    %411 = vector.broadcast %410 : f32 to vector<16x128xf32>
    %412 = arith.mulf %1, %411 : vector<16x128xf32>
    %c1_171 = arith.constant 1 : index
    %c20_172 = arith.constant 20 : index
    %413 = memref.load %arg2[%c1_171, %c20_172] : memref<3x32xf32, #tpu.memory_space<smem>>
    %414 = vector.broadcast %413 : f32 to vector<16x128xf32>
    %415 = arith.mulf %3, %414 : vector<16x128xf32>
    %416 = arith.addf %412, %415 : vector<16x128xf32>
    %c2_173 = arith.constant 2 : index
    %c20_174 = arith.constant 20 : index
    %417 = memref.load %arg2[%c2_173, %c20_174] : memref<3x32xf32, #tpu.memory_space<smem>>
    %418 = vector.broadcast %417 : f32 to vector<16x128xf32>
    %419 = arith.mulf %5, %418 : vector<16x128xf32>
    %420 = arith.addf %416, %419 : vector<16x128xf32>
    %c20_175 = arith.constant 20 : index
    %421 = memref.load %arg3[%c20_175] : memref<32xf32, #tpu.memory_space<smem>>
    %422 = vector.broadcast %421 : f32 to vector<16x128xf32>
    %423 = arith.addf %420, %422 : vector<16x128xf32>
    %cst_176 = arith.constant 0.000000e+00 : f32
    %424 = vector.broadcast %cst_176 : f32 to vector<16x128xf32>
    %425 = arith.maximumf %423, %424 : vector<16x128xf32>
    %c20_177 = arith.constant 20 : index
    %426 = memref.load %arg4[%c20_177] : memref<32xf32, #tpu.memory_space<smem>>
    %427 = vector.broadcast %426 : f32 to vector<16x128xf32>
    %428 = arith.mulf %425, %427 : vector<16x128xf32>
    %429 = arith.addf %409, %428 : vector<16x128xf32>
    %c0_178 = arith.constant 0 : index
    %c21 = arith.constant 21 : index
    %430 = memref.load %arg2[%c0_178, %c21] : memref<3x32xf32, #tpu.memory_space<smem>>
    %431 = vector.broadcast %430 : f32 to vector<16x128xf32>
    %432 = arith.mulf %1, %431 : vector<16x128xf32>
    %c1_179 = arith.constant 1 : index
    %c21_180 = arith.constant 21 : index
    %433 = memref.load %arg2[%c1_179, %c21_180] : memref<3x32xf32, #tpu.memory_space<smem>>
    %434 = vector.broadcast %433 : f32 to vector<16x128xf32>
    %435 = arith.mulf %3, %434 : vector<16x128xf32>
    %436 = arith.addf %432, %435 : vector<16x128xf32>
    %c2_181 = arith.constant 2 : index
    %c21_182 = arith.constant 21 : index
    %437 = memref.load %arg2[%c2_181, %c21_182] : memref<3x32xf32, #tpu.memory_space<smem>>
    %438 = vector.broadcast %437 : f32 to vector<16x128xf32>
    %439 = arith.mulf %5, %438 : vector<16x128xf32>
    %440 = arith.addf %436, %439 : vector<16x128xf32>
    %c21_183 = arith.constant 21 : index
    %441 = memref.load %arg3[%c21_183] : memref<32xf32, #tpu.memory_space<smem>>
    %442 = vector.broadcast %441 : f32 to vector<16x128xf32>
    %443 = arith.addf %440, %442 : vector<16x128xf32>
    %cst_184 = arith.constant 0.000000e+00 : f32
    %444 = vector.broadcast %cst_184 : f32 to vector<16x128xf32>
    %445 = arith.maximumf %443, %444 : vector<16x128xf32>
    %c21_185 = arith.constant 21 : index
    %446 = memref.load %arg4[%c21_185] : memref<32xf32, #tpu.memory_space<smem>>
    %447 = vector.broadcast %446 : f32 to vector<16x128xf32>
    %448 = arith.mulf %445, %447 : vector<16x128xf32>
    %449 = arith.addf %429, %448 : vector<16x128xf32>
    %c0_186 = arith.constant 0 : index
    %c22 = arith.constant 22 : index
    %450 = memref.load %arg2[%c0_186, %c22] : memref<3x32xf32, #tpu.memory_space<smem>>
    %451 = vector.broadcast %450 : f32 to vector<16x128xf32>
    %452 = arith.mulf %1, %451 : vector<16x128xf32>
    %c1_187 = arith.constant 1 : index
    %c22_188 = arith.constant 22 : index
    %453 = memref.load %arg2[%c1_187, %c22_188] : memref<3x32xf32, #tpu.memory_space<smem>>
    %454 = vector.broadcast %453 : f32 to vector<16x128xf32>
    %455 = arith.mulf %3, %454 : vector<16x128xf32>
    %456 = arith.addf %452, %455 : vector<16x128xf32>
    %c2_189 = arith.constant 2 : index
    %c22_190 = arith.constant 22 : index
    %457 = memref.load %arg2[%c2_189, %c22_190] : memref<3x32xf32, #tpu.memory_space<smem>>
    %458 = vector.broadcast %457 : f32 to vector<16x128xf32>
    %459 = arith.mulf %5, %458 : vector<16x128xf32>
    %460 = arith.addf %456, %459 : vector<16x128xf32>
    %c22_191 = arith.constant 22 : index
    %461 = memref.load %arg3[%c22_191] : memref<32xf32, #tpu.memory_space<smem>>
    %462 = vector.broadcast %461 : f32 to vector<16x128xf32>
    %463 = arith.addf %460, %462 : vector<16x128xf32>
    %cst_192 = arith.constant 0.000000e+00 : f32
    %464 = vector.broadcast %cst_192 : f32 to vector<16x128xf32>
    %465 = arith.maximumf %463, %464 : vector<16x128xf32>
    %c22_193 = arith.constant 22 : index
    %466 = memref.load %arg4[%c22_193] : memref<32xf32, #tpu.memory_space<smem>>
    %467 = vector.broadcast %466 : f32 to vector<16x128xf32>
    %468 = arith.mulf %465, %467 : vector<16x128xf32>
    %469 = arith.addf %449, %468 : vector<16x128xf32>
    %c0_194 = arith.constant 0 : index
    %c23 = arith.constant 23 : index
    %470 = memref.load %arg2[%c0_194, %c23] : memref<3x32xf32, #tpu.memory_space<smem>>
    %471 = vector.broadcast %470 : f32 to vector<16x128xf32>
    %472 = arith.mulf %1, %471 : vector<16x128xf32>
    %c1_195 = arith.constant 1 : index
    %c23_196 = arith.constant 23 : index
    %473 = memref.load %arg2[%c1_195, %c23_196] : memref<3x32xf32, #tpu.memory_space<smem>>
    %474 = vector.broadcast %473 : f32 to vector<16x128xf32>
    %475 = arith.mulf %3, %474 : vector<16x128xf32>
    %476 = arith.addf %472, %475 : vector<16x128xf32>
    %c2_197 = arith.constant 2 : index
    %c23_198 = arith.constant 23 : index
    %477 = memref.load %arg2[%c2_197, %c23_198] : memref<3x32xf32, #tpu.memory_space<smem>>
    %478 = vector.broadcast %477 : f32 to vector<16x128xf32>
    %479 = arith.mulf %5, %478 : vector<16x128xf32>
    %480 = arith.addf %476, %479 : vector<16x128xf32>
    %c23_199 = arith.constant 23 : index
    %481 = memref.load %arg3[%c23_199] : memref<32xf32, #tpu.memory_space<smem>>
    %482 = vector.broadcast %481 : f32 to vector<16x128xf32>
    %483 = arith.addf %480, %482 : vector<16x128xf32>
    %cst_200 = arith.constant 0.000000e+00 : f32
    %484 = vector.broadcast %cst_200 : f32 to vector<16x128xf32>
    %485 = arith.maximumf %483, %484 : vector<16x128xf32>
    %c23_201 = arith.constant 23 : index
    %486 = memref.load %arg4[%c23_201] : memref<32xf32, #tpu.memory_space<smem>>
    %487 = vector.broadcast %486 : f32 to vector<16x128xf32>
    %488 = arith.mulf %485, %487 : vector<16x128xf32>
    %489 = arith.addf %469, %488 : vector<16x128xf32>
    %c0_202 = arith.constant 0 : index
    %c24 = arith.constant 24 : index
    %490 = memref.load %arg2[%c0_202, %c24] : memref<3x32xf32, #tpu.memory_space<smem>>
    %491 = vector.broadcast %490 : f32 to vector<16x128xf32>
    %492 = arith.mulf %1, %491 : vector<16x128xf32>
    %c1_203 = arith.constant 1 : index
    %c24_204 = arith.constant 24 : index
    %493 = memref.load %arg2[%c1_203, %c24_204] : memref<3x32xf32, #tpu.memory_space<smem>>
    %494 = vector.broadcast %493 : f32 to vector<16x128xf32>
    %495 = arith.mulf %3, %494 : vector<16x128xf32>
    %496 = arith.addf %492, %495 : vector<16x128xf32>
    %c2_205 = arith.constant 2 : index
    %c24_206 = arith.constant 24 : index
    %497 = memref.load %arg2[%c2_205, %c24_206] : memref<3x32xf32, #tpu.memory_space<smem>>
    %498 = vector.broadcast %497 : f32 to vector<16x128xf32>
    %499 = arith.mulf %5, %498 : vector<16x128xf32>
    %500 = arith.addf %496, %499 : vector<16x128xf32>
    %c24_207 = arith.constant 24 : index
    %501 = memref.load %arg3[%c24_207] : memref<32xf32, #tpu.memory_space<smem>>
    %502 = vector.broadcast %501 : f32 to vector<16x128xf32>
    %503 = arith.addf %500, %502 : vector<16x128xf32>
    %cst_208 = arith.constant 0.000000e+00 : f32
    %504 = vector.broadcast %cst_208 : f32 to vector<16x128xf32>
    %505 = arith.maximumf %503, %504 : vector<16x128xf32>
    %c24_209 = arith.constant 24 : index
    %506 = memref.load %arg4[%c24_209] : memref<32xf32, #tpu.memory_space<smem>>
    %507 = vector.broadcast %506 : f32 to vector<16x128xf32>
    %508 = arith.mulf %505, %507 : vector<16x128xf32>
    %509 = arith.addf %489, %508 : vector<16x128xf32>
    %c0_210 = arith.constant 0 : index
    %c25 = arith.constant 25 : index
    %510 = memref.load %arg2[%c0_210, %c25] : memref<3x32xf32, #tpu.memory_space<smem>>
    %511 = vector.broadcast %510 : f32 to vector<16x128xf32>
    %512 = arith.mulf %1, %511 : vector<16x128xf32>
    %c1_211 = arith.constant 1 : index
    %c25_212 = arith.constant 25 : index
    %513 = memref.load %arg2[%c1_211, %c25_212] : memref<3x32xf32, #tpu.memory_space<smem>>
    %514 = vector.broadcast %513 : f32 to vector<16x128xf32>
    %515 = arith.mulf %3, %514 : vector<16x128xf32>
    %516 = arith.addf %512, %515 : vector<16x128xf32>
    %c2_213 = arith.constant 2 : index
    %c25_214 = arith.constant 25 : index
    %517 = memref.load %arg2[%c2_213, %c25_214] : memref<3x32xf32, #tpu.memory_space<smem>>
    %518 = vector.broadcast %517 : f32 to vector<16x128xf32>
    %519 = arith.mulf %5, %518 : vector<16x128xf32>
    %520 = arith.addf %516, %519 : vector<16x128xf32>
    %c25_215 = arith.constant 25 : index
    %521 = memref.load %arg3[%c25_215] : memref<32xf32, #tpu.memory_space<smem>>
    %522 = vector.broadcast %521 : f32 to vector<16x128xf32>
    %523 = arith.addf %520, %522 : vector<16x128xf32>
    %cst_216 = arith.constant 0.000000e+00 : f32
    %524 = vector.broadcast %cst_216 : f32 to vector<16x128xf32>
    %525 = arith.maximumf %523, %524 : vector<16x128xf32>
    %c25_217 = arith.constant 25 : index
    %526 = memref.load %arg4[%c25_217] : memref<32xf32, #tpu.memory_space<smem>>
    %527 = vector.broadcast %526 : f32 to vector<16x128xf32>
    %528 = arith.mulf %525, %527 : vector<16x128xf32>
    %529 = arith.addf %509, %528 : vector<16x128xf32>
    %c0_218 = arith.constant 0 : index
    %c26 = arith.constant 26 : index
    %530 = memref.load %arg2[%c0_218, %c26] : memref<3x32xf32, #tpu.memory_space<smem>>
    %531 = vector.broadcast %530 : f32 to vector<16x128xf32>
    %532 = arith.mulf %1, %531 : vector<16x128xf32>
    %c1_219 = arith.constant 1 : index
    %c26_220 = arith.constant 26 : index
    %533 = memref.load %arg2[%c1_219, %c26_220] : memref<3x32xf32, #tpu.memory_space<smem>>
    %534 = vector.broadcast %533 : f32 to vector<16x128xf32>
    %535 = arith.mulf %3, %534 : vector<16x128xf32>
    %536 = arith.addf %532, %535 : vector<16x128xf32>
    %c2_221 = arith.constant 2 : index
    %c26_222 = arith.constant 26 : index
    %537 = memref.load %arg2[%c2_221, %c26_222] : memref<3x32xf32, #tpu.memory_space<smem>>
    %538 = vector.broadcast %537 : f32 to vector<16x128xf32>
    %539 = arith.mulf %5, %538 : vector<16x128xf32>
    %540 = arith.addf %536, %539 : vector<16x128xf32>
    %c26_223 = arith.constant 26 : index
    %541 = memref.load %arg3[%c26_223] : memref<32xf32, #tpu.memory_space<smem>>
    %542 = vector.broadcast %541 : f32 to vector<16x128xf32>
    %543 = arith.addf %540, %542 : vector<16x128xf32>
    %cst_224 = arith.constant 0.000000e+00 : f32
    %544 = vector.broadcast %cst_224 : f32 to vector<16x128xf32>
    %545 = arith.maximumf %543, %544 : vector<16x128xf32>
    %c26_225 = arith.constant 26 : index
    %546 = memref.load %arg4[%c26_225] : memref<32xf32, #tpu.memory_space<smem>>
    %547 = vector.broadcast %546 : f32 to vector<16x128xf32>
    %548 = arith.mulf %545, %547 : vector<16x128xf32>
    %549 = arith.addf %529, %548 : vector<16x128xf32>
    %c0_226 = arith.constant 0 : index
    %c27 = arith.constant 27 : index
    %550 = memref.load %arg2[%c0_226, %c27] : memref<3x32xf32, #tpu.memory_space<smem>>
    %551 = vector.broadcast %550 : f32 to vector<16x128xf32>
    %552 = arith.mulf %1, %551 : vector<16x128xf32>
    %c1_227 = arith.constant 1 : index
    %c27_228 = arith.constant 27 : index
    %553 = memref.load %arg2[%c1_227, %c27_228] : memref<3x32xf32, #tpu.memory_space<smem>>
    %554 = vector.broadcast %553 : f32 to vector<16x128xf32>
    %555 = arith.mulf %3, %554 : vector<16x128xf32>
    %556 = arith.addf %552, %555 : vector<16x128xf32>
    %c2_229 = arith.constant 2 : index
    %c27_230 = arith.constant 27 : index
    %557 = memref.load %arg2[%c2_229, %c27_230] : memref<3x32xf32, #tpu.memory_space<smem>>
    %558 = vector.broadcast %557 : f32 to vector<16x128xf32>
    %559 = arith.mulf %5, %558 : vector<16x128xf32>
    %560 = arith.addf %556, %559 : vector<16x128xf32>
    %c27_231 = arith.constant 27 : index
    %561 = memref.load %arg3[%c27_231] : memref<32xf32, #tpu.memory_space<smem>>
    %562 = vector.broadcast %561 : f32 to vector<16x128xf32>
    %563 = arith.addf %560, %562 : vector<16x128xf32>
    %cst_232 = arith.constant 0.000000e+00 : f32
    %564 = vector.broadcast %cst_232 : f32 to vector<16x128xf32>
    %565 = arith.maximumf %563, %564 : vector<16x128xf32>
    %c27_233 = arith.constant 27 : index
    %566 = memref.load %arg4[%c27_233] : memref<32xf32, #tpu.memory_space<smem>>
    %567 = vector.broadcast %566 : f32 to vector<16x128xf32>
    %568 = arith.mulf %565, %567 : vector<16x128xf32>
    %569 = arith.addf %549, %568 : vector<16x128xf32>
    %c0_234 = arith.constant 0 : index
    %c28 = arith.constant 28 : index
    %570 = memref.load %arg2[%c0_234, %c28] : memref<3x32xf32, #tpu.memory_space<smem>>
    %571 = vector.broadcast %570 : f32 to vector<16x128xf32>
    %572 = arith.mulf %1, %571 : vector<16x128xf32>
    %c1_235 = arith.constant 1 : index
    %c28_236 = arith.constant 28 : index
    %573 = memref.load %arg2[%c1_235, %c28_236] : memref<3x32xf32, #tpu.memory_space<smem>>
    %574 = vector.broadcast %573 : f32 to vector<16x128xf32>
    %575 = arith.mulf %3, %574 : vector<16x128xf32>
    %576 = arith.addf %572, %575 : vector<16x128xf32>
    %c2_237 = arith.constant 2 : index
    %c28_238 = arith.constant 28 : index
    %577 = memref.load %arg2[%c2_237, %c28_238] : memref<3x32xf32, #tpu.memory_space<smem>>
    %578 = vector.broadcast %577 : f32 to vector<16x128xf32>
    %579 = arith.mulf %5, %578 : vector<16x128xf32>
    %580 = arith.addf %576, %579 : vector<16x128xf32>
    %c28_239 = arith.constant 28 : index
    %581 = memref.load %arg3[%c28_239] : memref<32xf32, #tpu.memory_space<smem>>
    %582 = vector.broadcast %581 : f32 to vector<16x128xf32>
    %583 = arith.addf %580, %582 : vector<16x128xf32>
    %cst_240 = arith.constant 0.000000e+00 : f32
    %584 = vector.broadcast %cst_240 : f32 to vector<16x128xf32>
    %585 = arith.maximumf %583, %584 : vector<16x128xf32>
    %c28_241 = arith.constant 28 : index
    %586 = memref.load %arg4[%c28_241] : memref<32xf32, #tpu.memory_space<smem>>
    %587 = vector.broadcast %586 : f32 to vector<16x128xf32>
    %588 = arith.mulf %585, %587 : vector<16x128xf32>
    %589 = arith.addf %569, %588 : vector<16x128xf32>
    %c0_242 = arith.constant 0 : index
    %c29 = arith.constant 29 : index
    %590 = memref.load %arg2[%c0_242, %c29] : memref<3x32xf32, #tpu.memory_space<smem>>
    %591 = vector.broadcast %590 : f32 to vector<16x128xf32>
    %592 = arith.mulf %1, %591 : vector<16x128xf32>
    %c1_243 = arith.constant 1 : index
    %c29_244 = arith.constant 29 : index
    %593 = memref.load %arg2[%c1_243, %c29_244] : memref<3x32xf32, #tpu.memory_space<smem>>
    %594 = vector.broadcast %593 : f32 to vector<16x128xf32>
    %595 = arith.mulf %3, %594 : vector<16x128xf32>
    %596 = arith.addf %592, %595 : vector<16x128xf32>
    %c2_245 = arith.constant 2 : index
    %c29_246 = arith.constant 29 : index
    %597 = memref.load %arg2[%c2_245, %c29_246] : memref<3x32xf32, #tpu.memory_space<smem>>
    %598 = vector.broadcast %597 : f32 to vector<16x128xf32>
    %599 = arith.mulf %5, %598 : vector<16x128xf32>
    %600 = arith.addf %596, %599 : vector<16x128xf32>
    %c29_247 = arith.constant 29 : index
    %601 = memref.load %arg3[%c29_247] : memref<32xf32, #tpu.memory_space<smem>>
    %602 = vector.broadcast %601 : f32 to vector<16x128xf32>
    %603 = arith.addf %600, %602 : vector<16x128xf32>
    %cst_248 = arith.constant 0.000000e+00 : f32
    %604 = vector.broadcast %cst_248 : f32 to vector<16x128xf32>
    %605 = arith.maximumf %603, %604 : vector<16x128xf32>
    %c29_249 = arith.constant 29 : index
    %606 = memref.load %arg4[%c29_249] : memref<32xf32, #tpu.memory_space<smem>>
    %607 = vector.broadcast %606 : f32 to vector<16x128xf32>
    %608 = arith.mulf %605, %607 : vector<16x128xf32>
    %609 = arith.addf %589, %608 : vector<16x128xf32>
    %c0_250 = arith.constant 0 : index
    %c30 = arith.constant 30 : index
    %610 = memref.load %arg2[%c0_250, %c30] : memref<3x32xf32, #tpu.memory_space<smem>>
    %611 = vector.broadcast %610 : f32 to vector<16x128xf32>
    %612 = arith.mulf %1, %611 : vector<16x128xf32>
    %c1_251 = arith.constant 1 : index
    %c30_252 = arith.constant 30 : index
    %613 = memref.load %arg2[%c1_251, %c30_252] : memref<3x32xf32, #tpu.memory_space<smem>>
    %614 = vector.broadcast %613 : f32 to vector<16x128xf32>
    %615 = arith.mulf %3, %614 : vector<16x128xf32>
    %616 = arith.addf %612, %615 : vector<16x128xf32>
    %c2_253 = arith.constant 2 : index
    %c30_254 = arith.constant 30 : index
    %617 = memref.load %arg2[%c2_253, %c30_254] : memref<3x32xf32, #tpu.memory_space<smem>>
    %618 = vector.broadcast %617 : f32 to vector<16x128xf32>
    %619 = arith.mulf %5, %618 : vector<16x128xf32>
    %620 = arith.addf %616, %619 : vector<16x128xf32>
    %c30_255 = arith.constant 30 : index
    %621 = memref.load %arg3[%c30_255] : memref<32xf32, #tpu.memory_space<smem>>
    %622 = vector.broadcast %621 : f32 to vector<16x128xf32>
    %623 = arith.addf %620, %622 : vector<16x128xf32>
    %cst_256 = arith.constant 0.000000e+00 : f32
    %624 = vector.broadcast %cst_256 : f32 to vector<16x128xf32>
    %625 = arith.maximumf %623, %624 : vector<16x128xf32>
    %c30_257 = arith.constant 30 : index
    %626 = memref.load %arg4[%c30_257] : memref<32xf32, #tpu.memory_space<smem>>
    %627 = vector.broadcast %626 : f32 to vector<16x128xf32>
    %628 = arith.mulf %625, %627 : vector<16x128xf32>
    %629 = arith.addf %609, %628 : vector<16x128xf32>
    %c0_258 = arith.constant 0 : index
    %c31 = arith.constant 31 : index
    %630 = memref.load %arg2[%c0_258, %c31] : memref<3x32xf32, #tpu.memory_space<smem>>
    %631 = vector.broadcast %630 : f32 to vector<16x128xf32>
    %632 = arith.mulf %1, %631 : vector<16x128xf32>
    %c1_259 = arith.constant 1 : index
    %c31_260 = arith.constant 31 : index
    %633 = memref.load %arg2[%c1_259, %c31_260] : memref<3x32xf32, #tpu.memory_space<smem>>
    %634 = vector.broadcast %633 : f32 to vector<16x128xf32>
    %635 = arith.mulf %3, %634 : vector<16x128xf32>
    %636 = arith.addf %632, %635 : vector<16x128xf32>
    %c2_261 = arith.constant 2 : index
    %c31_262 = arith.constant 31 : index
    %637 = memref.load %arg2[%c2_261, %c31_262] : memref<3x32xf32, #tpu.memory_space<smem>>
    %638 = vector.broadcast %637 : f32 to vector<16x128xf32>
    %639 = arith.mulf %5, %638 : vector<16x128xf32>
    %640 = arith.addf %636, %639 : vector<16x128xf32>
    %c31_263 = arith.constant 31 : index
    %641 = memref.load %arg3[%c31_263] : memref<32xf32, #tpu.memory_space<smem>>
    %642 = vector.broadcast %641 : f32 to vector<16x128xf32>
    %643 = arith.addf %640, %642 : vector<16x128xf32>
    %cst_264 = arith.constant 0.000000e+00 : f32
    %644 = vector.broadcast %cst_264 : f32 to vector<16x128xf32>
    %645 = arith.maximumf %643, %644 : vector<16x128xf32>
    %c31_265 = arith.constant 31 : index
    %646 = memref.load %arg4[%c31_265] : memref<32xf32, #tpu.memory_space<smem>>
    %647 = vector.broadcast %646 : f32 to vector<16x128xf32>
    %648 = arith.mulf %645, %647 : vector<16x128xf32>
    %649 = arith.addf %629, %648 : vector<16x128xf32>
    %c0_266 = arith.constant 0 : index
    %c0_267 = arith.constant 0 : index
    %650 = vector.load %arg6[%c0_266, %c0_267] : memref<16x128xf32, #tpu.memory_space<vmem>>, vector<16x128xf32>
    tpu.vector_store %arg6[%c0_266, %c0_267], %649 {strides = array<i32>} : memref<16x128xf32, #tpu.memory_space<vmem>>, vector<16x128xf32>,
    return
  }
  func.func @transform_0(%arg0: i32) -> (i32, i32, i32) {
    %c0_i32 = arith.constant 0 : i32
    %c0_i32_0 = arith.constant 0 : i32
    %c0_i32_1 = arith.constant 0 : i32
    return %c0_i32, %c0_i32_0, %arg0 : i32, i32, i32
  }
  func.func @transform_1(%arg0: i32) -> (i32, i32) {
    %c0_i32 = arith.constant 0 : i32
    %c0_i32_0 = arith.constant 0 : i32
    %c0_i32_1 = arith.constant 0 : i32
    return %c0_i32, %c0_i32_0 : i32, i32
  }
  func.func @transform_2(%arg0: i32) -> i32 {
    %c0_i32 = arith.constant 0 : i32
    %c0_i32_0 = arith.constant 0 : i32
    return %c0_i32 : i32
  }
  func.func @transform_3(%arg0: i32) -> i32 {
    %c0_i32 = arith.constant 0 : i32
    %c0_i32_0 = arith.constant 0 : i32
    return %c0_i32 : i32
  }
  func.func @transform_4(%arg0: i32) -> i32 {
    %c0_i32 = arith.constant 0 : i32
    %c0_i32_0 = arith.constant 0 : i32
    return %c0_i32 : i32
  }
  func.func @transform_5(%arg0: i32) -> (i32, i32) {
    %c0_i32 = arith.constant 0 : i32
    %c0_i32_0 = arith.constant 0 : i32
    return %c0_i32, %arg0 : i32, i32
  }
}

</mosaic_0001>

<bundles_post_ra>
// kernel: simulate_conv1d.1
= control target key start
LH: loop header
LB: loop body
LE: loop exit
PB: predicated region body
PF: predicated region fallthrough
CT: control target
= control target key end

     0   :  { %11 = vsyncpa [#allocation4], 0  ;;  %s1944_s0 = inlined_call_operand.vmem [shape: f32[1,18,128], index: 0, kind: input, shape index: {}]   ;;  %s1945_s1 = inlined_call_operand.vmem [shape: f32[3,32], index: 1, kind: input, shape index: {}]   ;;  %s1946_s2 = inlined_call_operand.vmem [shape: f32[32], index: 2, kind: input, shape index: {}]   ;;  %s1947_s3 = inlined_call_operand.vmem [shape: f32[32], index: 3, kind: input, shape index: {}]   ;;  %s1948_s4 = inlined_call_operand.<no memory space> [shape: f32[1], index: 4, kind: input, shape index: {}]   ;;  %s1949_s5 = inlined_call_operand.vmem [shape: f32[16,128], index: 5, kind: output, shape index: {}]  }
   0x1   :  { %12 = vsyncpa [#allocation6], 0  ;;  %s31_s20 = sshll.u32 %s1946_s2, 4  ;;  %s21_s23 = sshll.u32 %s1945_s1, 4  ;;  %s32_s20 = int_to_ptr.vmem [resolvable:$true] %s31_s20  ;;  %s22_s23 = int_to_ptr.vmem [resolvable:$true] %s21_s23 }
   0x2   :  { %s1136_s24 = scalar_lea.vmem %s32_s20, 16  ;;  %p1141_p1 = scmp.lt.s32.totalorder %s32_s20, %s32_s20 }
   0x3   :  { %p1137_p0 = scmp.ne.s32.totalorder %s32_s20, %s1136_s24  ;;  %p1142_p2 = scmp.lt.s32.totalorder %s1136_s24, %s1136_s24 }
   0x5   :  { %p1143_p3 = por %p1142_p2, %p1141_p1 }
   0x7   :  { %p1144_p4 = pnand %p1143_p3, %p1137_p0 }
   0x9   :  { %1147 = shalt.err (!%p1144_p4)
}
   0xa   :  { %s1176_s25 = smov [#allocation5]   ;;  %s1148_s26 = scalar_lea.vmem %s22_s23, 64 }
   0xb   :  { %34 = dma.vmem_to_smem %s32_s20, 16, %s1176_s25, [#allocation6]  }
   0xc   :  { %p1149_p5 = scmp.ne.s32.totalorder %s22_s23, %s1148_s26  ;;  %p1153_p6 = scmp.lt.s32.totalorder %s22_s23, %s22_s23 }
   0xd   :  { %p1154_p7 = scmp.lt.s32.totalorder %s1148_s26, %s1148_s26 }
   0xf   :  { %p1155_p8 = por %p1154_p7, %p1153_p6 }
  0x11   :  { %p1156_p9 = pnand %p1155_p8, %p1149_p5 }
  0x13   :  { %1159 = shalt.err (!%p1156_p9)
}
  0x14   :  { %s1177_s2 = smov [#allocation3]   ;;  %s41_s28 = sshll.u32 %s1947_s3, 4  ;;  %s42_s28 = int_to_ptr.vmem [resolvable:$true] %s41_s28 }
  0x15   :  { %24 = dma.vmem_to_smem %s22_s23, 64, %s1177_s2, [#allocation4]  }
  0x16   :  { %s1160_s29 = scalar_lea.vmem %s42_s28, 16  ;;  %p1165_p11 = scmp.lt.s32.totalorder %s42_s28, %s42_s28 }
  0x17   :  { %p1161_p10 = scmp.ne.s32.totalorder %s42_s28, %s1160_s29  ;;  %p1166_p12 = scmp.lt.s32.totalorder %s1160_s29, %s1160_s29 }
  0x19   :  { %p1167_p13 = por %p1166_p12, %p1165_p11 }
  0x1b   :  { %p1168_p0 = pnand %p1167_p13, %p1161_p10 }
  0x1d   :  { %1171 = shalt.err (!%p1168_p0)
}
  0x1e   :  { %s1178_s30 = smov [#allocation7]  }
  0x1f   :  { %44 = dma.vmem_to_smem %s42_s28, 16, %s1178_s30, [#allocation6]  }
  0x20   :  { %1172 = dma.done.wait [#allocation4], 64  }
  0x21   :  { %1173 = vsyncadd [#allocation4], 4294967232 }
  0x22   :  { %1174 = dma.done.wait [#allocation6], 32  }
  0x23   :  { %1175 = vsyncadd [#allocation6], 4294967264 }
  0x24   :  { %56 = sfence }
  0x25   :  { %s66_s6 = sld [smem:[#allocation3]]  ;;  %s972_s10 = sld [smem:[#allocation3 + $0x1]]  ;;  %v1225_v0 = vld [vmem:[%s1944_s0] sm:$0xff]  ;;  %v1230_v1 = vld [vmem:[%s1944_s0 + $0x8] sm:$0xff]  ;;  %v64_v10 = vstv %s1948_s4 }
  0x26   :  { %s970_s7 = sld [smem:[#allocation3 + $0x80]]  ;;  %s1232_s15 = sld [smem:[#allocation3 + $0x81]]  ;;  %v1239_v2 = vld [vmem:[%s1944_s0 + $0x1] sm:$0xff]  ;;  %v1244_v3 = vld [vmem:[%s1944_s0 + $0x9] sm:$0xff] }
  0x27   :  { %s971_s8 = sld [smem:[#allocation3 + $0x100]]  ;;  %s1234_s16 = sld [smem:[#allocation3 + $0x101]]  ;;  %v1251_v4 = vld [vmem:[%s1944_s0 + $0x2] sm:$0xff]  ;;  %v1256_v5 = vld [vmem:[%s1944_s0 + $0xa] sm:$0xff] }
  0x28   :  { %s1218_s9 = sld [smem:[#allocation5]]  ;;  %s1246_s21 = sld [smem:[#allocation5 + $0x1]] }
  0x29   :  { %s1220_s3 = sld [smem:[#allocation7]]  ;;  %s1258_s26 = sld [smem:[#allocation3 + $0x2]] }
  0x2a   :  { %s1260_s2 = sld [smem:[#allocation3 + $0x82]]  ;;  %s1272_s28 = sld [smem:[#allocation7 + $0x1]] }
  0x2b   :  { %v67_v6 = vstv %s66_s6  ;;  %v95_v17 = vstv %s972_s10  ;;  %s1274_s29 = sld [smem:[#allocation3 + $0x102]]  ;;  %s1284_s30 = sld [smem:[#allocation3 + $0x3]] }
  0x2c   :  { %v68_v7 = vmul.f32 %v67_v6, %v1225_v0  ;;  %v69_v8 = vmul.f32 %v67_v6, %v1230_v1  ;;  %v71_v9 = vstv %s970_s7  ;;  %v96_v20 = vmul.f32 %v95_v17, %v1225_v0  ;;  %s1282_s4 = sld [smem:[#allocation5 + $0x2]]  ;;  %s1292_s6 = sld [smem:[#allocation3 + $0x83]] }
  0x2d   :  { %v72_v11 = vmul.f32 %v71_v9, %v1239_v2  ;;  %v73_v12 = vmul.f32 %v71_v9, %v1244_v3  ;;  %v77_v13 = vstv %s971_s8  ;;  %v97_v21 = vmul.f32 %v95_v17, %v1230_v1  ;;  %s1294_s7 = sld [smem:[#allocation3 + $0x103]]  ;;  %s1300_s8 = sld [smem:[#allocation7 + $0x2]] }
  0x2e   :  { %v78_v14 = vmul.f32 %v77_v13, %v1251_v4  ;;  %v79_v15 = vmul.f32 %v77_v13, %v1256_v5  ;;  %v83_v16 = vstv %s1218_s9  ;;  %v99_v23 = vstv %s1232_s15  ;;  %s1304_s9 = sld [smem:[#allocation5 + $0x3]]  ;;  %s1308_s10 = sld [smem:[#allocation3 + $0x84]] }
  0x2f   :  { %v74_v18 = vadd.f32 %v72_v11, %v68_v7  ;;  %v75_v19 = vadd.f32 %v73_v12, %v69_v8  ;;  %v89_v22 = vstv %s1220_s3  ;;  %v105_v24 = vstv %s1234_s16  ;;  %s1306_s3 = sld [smem:[#allocation3 + $0x4]]  ;;  %s1316_s11 = sld [smem:[#allocation7 + $0x3]] }
  0x30   :  { %v111_v25 = vstv %s1246_s21  ;;  %v100_v28 = vmul.f32 %v99_v23, %v1239_v2  ;;  %v101_v29 = vmul.f32 %v99_v23, %v1244_v3  ;;  %v106_v30 = vmul.f32 %v105_v24, %v1251_v4  ;;  %s1320_s12 = sld [smem:[#allocation3 + $0x104]]  ;;  %s1326_s14 = sld [smem:[#allocation3 + $0x5]] }
  0x31   :  { %v80_v26 = vadd.f32 %v78_v14, %v74_v18  ;;  %v81_v27 = vadd.f32 %v79_v15, %v75_v19  ;;  %v107_v31 = vmul.f32 %v105_v24, %v1256_v5  ;;  %v123_v32 = vstv %s1258_s26  ;;  %s1324_s13 = sld [smem:[#allocation5 + $0x4]]  ;;  %s1331_s15 = sld [smem:[#allocation3 + $0x85]] }
  0x32   :  { %v127_v33 = vstv %s1260_s2  ;;  %v102_v36 = vadd.f32 %v100_v28, %v96_v20  ;;  %v103_v37 = vadd.f32 %v101_v29, %v97_v21  ;;  %v124_v38 = vmul.f32 %v123_v32, %v1225_v0  ;;  %s1333_s16 = sld [smem:[#allocation3 + $0x105]]  ;;  %s1338_s17 = sld [smem:[#allocation7 + $0x4]] }
  0x33   :  { %v84_v34 = vadd.f32 %v83_v16, %v80_v26  ;;  %v85_v35 = vadd.f32 %v83_v16, %v81_v27  ;;  %v125_v39 = vmul.f32 %v123_v32, %v1230_v1  ;;  %v128_v40 = vmul.f32 %v127_v33, %v1239_v2  ;;  %s1345_s18 = sld [smem:[#allocation5 + $0x5]]  ;;  %s1348_s19 = sld [smem:[#allocation3 + $0x6]] }
  0x34   :  { %v129_v41 = vmul.f32 %v127_v33, %v1244_v3  ;;  %v108_v44 = vadd.f32 %v106_v30, %v102_v36  ;;  %v109_v45 = vadd.f32 %v107_v31, %v103_v37  ;;  %v117_v46 = vstv %s1272_s28  ;;  %s1350_s20 = sld [smem:[#allocation3 + $0x86]]  ;;  %s1358_s21 = sld [smem:[#allocation7 + $0x5]] }
  0x35   :  { %v86_v42 = vmax.f32 %v84_v34, 0.0  ;;  %v87_v43 = vmax.f32 %v85_v35, 0.0  ;;  %v130_v47 = vadd.f32 %v128_v40, %v124_v38  ;;  %v133_v49 = vstv %s1274_s29  ;;  %s1360_s22 = sld [smem:[#allocation3 + $0x106]]  ;;  %s1369_s24 = sld [smem:[#allocation3 + $0x7]] }
  0x36   :  { %v131_v48 = vadd.f32 %v129_v41, %v125_v39  ;;  %v112_v52 = vadd.f32 %v111_v25, %v108_v44  ;;  %v113_v53 = vadd.f32 %v111_v25, %v109_v45  ;;  %v134_v54 = vmul.f32 %v133_v49, %v1251_v4  ;;  %s1367_s23 = sld [smem:[#allocation5 + $0x6]]  ;;  %s1374_s25 = sld [smem:[#allocation3 + $0x87]] }
  0x37   :  { %v90_v50 = vmul.f32 %v89_v22, %v86_v42  ;;  %v91_v51 = vmul.f32 %v89_v22, %v87_v43  ;;  %v135_v55 = vmul.f32 %v133_v49, %v1256_v5  ;;  %v139_v56 = vstv %s1282_s4  ;;  %s1376_s26 = sld [smem:[#allocation3 + $0x107]]  ;;  %s1380_s2 = sld [smem:[#allocation7 + $0x6]] }
  0x38   :  { %v151_v57 = vstv %s1284_s30  ;;  %v114_v60 = vmax.f32 %v112_v52, 0.0  ;;  %v115_v61 = vmax.f32 %v113_v53, 0.0  ;;  %v136_v62 = vadd.f32 %v134_v54, %v130_v47  ;;  %s1386_s1 = sld [smem:[#allocation5 + $0x7]]  ;;  %s1390_s27 = sld [smem:[#allocation3 + $0x8]] }
  0x39   :  { %v92_v58 = vadd.f32 %v90_v50, %v64_v10  ;;  %v93_v59 = vadd.f32 %v91_v51, %v64_v10  ;;  %v137_v63 = vadd.f32 %v135_v55, %v131_v48  ;;  %v152_v6 = vmul.f32 %v151_v57, %v1225_v0  ;;  %s1392_s28 = sld [smem:[#allocation3 + $0x88]]  ;;  %s1400_s29 = sld [smem:[#allocation7 + $0x7]] }
  0x3a   :  { %v153_v7 = vmul.f32 %v151_v57, %v1230_v1  ;;  %v118_v8 = vmul.f32 %v117_v46, %v114_v60  ;;  %v119_v9 = vmul.f32 %v117_v46, %v115_v61  ;;  %v155_v11 = vstv %s1292_s6  ;;  %s1402_s4 = sld [smem:[#allocation3 + $0x108]]  ;;  %s1411_s6 = sld [smem:[#allocation3 + $0x9]] }
  0x3b   :  { %v161_v12 = vstv %s1294_s7  ;;  %v140_v13 = vadd.f32 %v139_v56, %v136_v62  ;;  %v141_v14 = vadd.f32 %v139_v56, %v137_v63  ;;  %v156_v10 = vmul.f32 %v155_v11, %v1239_v2  ;;  %s1406_s30 = sld [smem:[#allocation5 + $0x8]]  ;;  %s1415_s7 = sld [smem:[#allocation3 + $0x89]] }
  0x3c   :  { %v157_v15 = vmul.f32 %v155_v11, %v1244_v3  ;;  %v120_v16 = vadd.f32 %v118_v8, %v92_v58  ;;  %v145_v17 = vstv %s1300_s8  ;;  %v162_v18 = vmul.f32 %v161_v12, %v1251_v4  ;;  %s1417_s8 = sld [smem:[#allocation3 + $0x109]] }
  0x3d   :  { %v163_v19 = vmul.f32 %v161_v12, %v1256_v5  ;;  %v142_v20 = vmax.f32 %v140_v13, 0.0  ;;  %v143_v21 = vmax.f32 %v141_v14, 0.0  ;;  %v158_v22 = vadd.f32 %v156_v10, %v152_v6 }
  0x3e   :  { %v159_v23 = vadd.f32 %v157_v15, %v153_v7  ;;  %v121_v24 = vadd.f32 %v119_v9, %v93_v59  ;;  %v167_v25 = vstv %s1304_s9  ;;  %v179_v26 = vstv %s1306_s3  ;;  %s1424_s9 = sld [smem:[#allocation7 + $0x8]]  ;;  %s1430_s3 = sld [smem:[#allocation5 + $0x9]] }
  0x3f   :  { %v183_v27 = vstv %s1308_s10  ;;  %v146_v28 = vmul.f32 %v145_v17, %v142_v20  ;;  %v147_v29 = vmul.f32 %v145_v17, %v143_v21  ;;  %v164_v30 = vadd.f32 %v162_v18, %v158_v22  ;;  %s1433_s10 = sld [smem:[#allocation3 + $0xa]] }
  0x40   :  { %v165_v31 = vadd.f32 %v163_v19, %v159_v23  ;;  %v180_v32 = vmul.f32 %v179_v26, %v1225_v0  ;;  %v181_v33 = vmul.f32 %v179_v26, %v1230_v1  ;;  %v184_v34 = vmul.f32 %v183_v27, %v1239_v2 }
  0x41   :  { %v185_v35 = vmul.f32 %v183_v27, %v1244_v3  ;;  %v148_v36 = vadd.f32 %v146_v28, %v120_v16  ;;  %v168_v37 = vadd.f32 %v167_v25, %v164_v30  ;;  %v173_v39 = vstv %s1316_s11  ;;  %s1435_s11 = sld [smem:[#allocation3 + $0x8a]] }
  0x42   :  { %v169_v38 = vadd.f32 %v167_v25, %v165_v31  ;;  %v149_v40 = vadd.f32 %v147_v29, %v121_v24  ;;  %v186_v41 = vadd.f32 %v184_v34, %v180_v32  ;;  %v189_v43 = vstv %s1320_s12  ;;  %s1442_s12 = sld [smem:[#allocation7 + $0x9]] }
  0x43   :  { %v187_v42 = vadd.f32 %v185_v35, %v181_v33  ;;  %v170_v44 = vmax.f32 %v168_v37, 0.0  ;;  %v190_v46 = vmul.f32 %v189_v43, %v1251_v4  ;;  %v191_v47 = vmul.f32 %v189_v43, %v1256_v5 }
  0x44   :  { %v171_v45 = vmax.f32 %v169_v38, 0.0  ;;  %v195_v48 = vstv %s1324_s13  ;;  %v207_v49 = vstv %s1326_s14  ;;  %v211_v50 = vstv %s1331_s15  ;;  %s1444_s13 = sld [smem:[#allocation3 + $0x10a]]  ;;  %s1453_s15 = sld [smem:[#allocation3 + $0xb]] }
  0x45   :  { %v217_v51 = vstv %s1333_s16  ;;  %v174_v52 = vmul.f32 %v173_v39, %v170_v44  ;;  %v192_v54 = vadd.f32 %v190_v46, %v186_v41  ;;  %v193_v55 = vadd.f32 %v191_v47, %v187_v42  ;;  %s1451_s14 = sld [smem:[#allocation5 + $0xa]]  ;;  %s1458_s16 = sld [smem:[#allocation3 + $0x8b]] }
  0x46   :  { %v175_v53 = vmul.f32 %v173_v39, %v171_v45  ;;  %v208_v56 = vmul.f32 %v207_v49, %v1225_v0  ;;  %v209_v57 = vmul.f32 %v207_v49, %v1230_v1  ;;  %v212_v58 = vmul.f32 %v211_v50, %v1239_v2 }
  0x47   :  { %v213_v59 = vmul.f32 %v211_v50, %v1244_v3  ;;  %v176_v60 = vadd.f32 %v174_v52, %v148_v36  ;;  %v196_v61 = vadd.f32 %v195_v48, %v192_v54  ;;  %v197_v62 = vadd.f32 %v195_v48, %v193_v55 }
  0x48   :  { %v201_v63 = vstv %s1338_s17  ;;  %v214_v6 = vadd.f32 %v212_v58, %v208_v56  ;;  %v218_v8 = vmul.f32 %v217_v51, %v1251_v4  ;;  %v219_v9 = vmul.f32 %v217_v51, %v1256_v5  ;;  %s1460_s17 = sld [smem:[#allocation3 + $0x10b]] }
  0x49   :  { %v215_v7 = vadd.f32 %v213_v59, %v209_v57  ;;  %v177_v11 = vadd.f32 %v175_v53, %v149_v40  ;;  %v198_v12 = vmax.f32 %v196_v61, 0.0  ;;  %v199_v13 = vmax.f32 %v197_v62, 0.0 }
  0x4a   :  { %v223_v14 = vstv %s1345_s18  ;;  %v220_v10 = vadd.f32 %v218_v8, %v214_v6  ;;  %v235_v16 = vstv %s1348_s19  ;;  %v239_v17 = vstv %s1350_s20  ;;  %s1464_s18 = sld [smem:[#allocation7 + $0xa]]  ;;  %s1470_s19 = sld [smem:[#allocation5 + $0xb]] }
  0x4b   :  { %v221_v15 = vadd.f32 %v219_v9, %v215_v7  ;;  %v202_v18 = vmul.f32 %v201_v63, %v198_v12  ;;  %v203_v19 = vmul.f32 %v201_v63, %v199_v13  ;;  %v236_v20 = vmul.f32 %v235_v16, %v1225_v0  ;;  %s1474_s20 = sld [smem:[#allocation3 + $0xc]] }
  0x4c   :  { %v237_v21 = vmul.f32 %v235_v16, %v1230_v1  ;;  %v224_v22 = vadd.f32 %v223_v14, %v220_v10  ;;  %v240_v24 = vmul.f32 %v239_v17, %v1239_v2  ;;  %v241_v25 = vmul.f32 %v239_v17, %v1244_v3 }
  0x4d   :  { %v225_v23 = vadd.f32 %v223_v14, %v221_v15  ;;  %v204_v26 = vadd.f32 %v202_v18, %v176_v60  ;;  %v205_v27 = vadd.f32 %v203_v19, %v177_v11  ;;  %v229_v28 = vstv %s1358_s21  ;;  %s1476_s21 = sld [smem:[#allocation3 + $0x8c]] }
  0x4e   :  { %v245_v29 = vstv %s1360_s22  ;;  %v226_v30 = vmax.f32 %v224_v22, 0.0  ;;  %v242_v32 = vadd.f32 %v240_v24, %v236_v20  ;;  %v243_v33 = vadd.f32 %v241_v25, %v237_v21  ;;  %s1484_s22 = sld [smem:[#allocation7 + $0xb]] }
  0x4f   :  { %v227_v31 = vmax.f32 %v225_v23, 0.0  ;;  %v246_v34 = vmul.f32 %v245_v29, %v1251_v4  ;;  %v247_v35 = vmul.f32 %v245_v29, %v1256_v5  ;;  %v251_v36 = vstv %s1367_s23  ;;  %s1486_s23 = sld [smem:[#allocation3 + $0x10c]] }
  0x50   :  { %v263_v37 = vstv %s1369_s24  ;;  %v230_v38 = vmul.f32 %v229_v28, %v226_v30  ;;  %v267_v44 = vstv %s1374_s25  ;;  %v273_v45 = vstv %s1376_s26  ;;  %s1490_s24 = sld [smem:[#allocation5 + $0xc]]  ;;  %s1495_s25 = sld [smem:[#allocation3 + $0xd]] }
  0x51   :  { %v231_v39 = vmul.f32 %v229_v28, %v227_v31  ;;  %v264_v40 = vmul.f32 %v263_v37, %v1225_v0  ;;  %v265_v41 = vmul.f32 %v263_v37, %v1230_v1  ;;  %v248_v42 = vadd.f32 %v246_v34, %v242_v32  ;;  %s1499_s26 = sld [smem:[#allocation3 + $0x8d]] }
  0x52   :  { %v249_v43 = vadd.f32 %v247_v35, %v243_v33  ;;  %v232_v46 = vadd.f32 %v230_v38, %v204_v26  ;;  %v257_v47 = vstv %s1380_s2  ;;  %v268_v48 = vmul.f32 %v267_v44, %v1239_v2  ;;  %s1501_s2 = sld [smem:[#allocation3 + $0x10d]] }
  0x53   :  { %v269_v49 = vmul.f32 %v267_v44, %v1244_v3  ;;  %v252_v50 = vadd.f32 %v251_v36, %v248_v42  ;;  %v274_v52 = vmul.f32 %v273_v45, %v1251_v4  ;;  %v275_v53 = vmul.f32 %v273_v45, %v1256_v5 }
  0x54   :  { %v253_v51 = vadd.f32 %v251_v36, %v249_v43  ;;  %v233_v54 = vadd.f32 %v231_v39, %v205_v27  ;;  %v270_v55 = vadd.f32 %v268_v48, %v264_v40  ;;  %v279_v57 = vstv %s1386_s1  ;;  %s1508_s1 = sld [smem:[#allocation7 + $0xc]] }
  0x55   :  { %v271_v56 = vadd.f32 %v269_v49, %v265_v41  ;;  %v254_v58 = vmax.f32 %v252_v50, 0.0  ;;  %v291_v60 = vstv %s1390_s27  ;;  %v295_v61 = vstv %s1392_s28  ;;  %s1514_s27 = sld [smem:[#allocation5 + $0xd]]  ;;  %s1517_s28 = sld [smem:[#allocation3 + $0xe]] }
  0x56   :  { %v255_v59 = vmax.f32 %v253_v51, 0.0  ;;  %v276_v62 = vadd.f32 %v274_v52, %v270_v55  ;;  %v292_v6 = vmul.f32 %v291_v60, %v1225_v0  ;;  %v293_v7 = vmul.f32 %v291_v60, %v1230_v1 }
  0x57   :  { %v277_v63 = vadd.f32 %v275_v53, %v271_v56  ;;  %v258_v8 = vmul.f32 %v257_v47, %v254_v58  ;;  %v296_v11 = vmul.f32 %v295_v61, %v1239_v2  ;;  %v297_v12 = vmul.f32 %v295_v61, %v1244_v3 }
  0x58   :  { %v259_v9 = vmul.f32 %v257_v47, %v255_v59  ;;  %v280_v13 = vadd.f32 %v279_v57, %v276_v62  ;;  %v285_v10 = vstv %s1400_s29  ;;  %v301_v15 = vstv %s1402_s4  ;;  %s1519_s29 = sld [smem:[#allocation3 + $0x8e]]  ;;  %s1526_s4 = sld [smem:[#allocation7 + $0xd]] }
  0x59   :  { %v281_v14 = vadd.f32 %v279_v57, %v277_v63  ;;  %v260_v16 = vadd.f32 %v258_v8, %v232_v46  ;;  %v298_v17 = vadd.f32 %v296_v11, %v292_v6  ;;  %v299_v18 = vadd.f32 %v297_v12, %v293_v7 }
  0x5a   :  { %v307_v19 = vstv %s1406_s30  ;;  %v282_v20 = vmax.f32 %v280_v13, 0.0  ;;  %v302_v22 = vmul.f32 %v301_v15, %v1251_v4  ;;  %v303_v23 = vmul.f32 %v301_v15, %v1256_v5  ;;  %s1528_s30 = sld [smem:[#allocation3 + $0x10e]] }
  0x5b   :  { %v283_v21 = vmax.f32 %v281_v14, 0.0  ;;  %v261_v24 = vadd.f32 %v259_v9, %v233_v54  ;;  %v319_v25 = vstv %s1411_s6  ;;  %v323_v26 = vstv %s1415_s7  ;;  %s1535_s6 = sld [smem:[#allocation5 + $0xe]]  ;;  %s1537_s7 = sld [smem:[#allocation3 + $0xf]] }
  0x5c   :  { %v329_v27 = vstv %s1417_s8  ;;  %v286_v28 = vmul.f32 %v285_v10, %v282_v20  ;;  %v304_v30 = vadd.f32 %v302_v22, %v298_v17  ;;  %v305_v31 = vadd.f32 %v303_v23, %v299_v18  ;;  %s1542_s8 = sld [smem:[#allocation3 + $0x8f]] }
  0x5d   :  { %v287_v29 = vmul.f32 %v285_v10, %v283_v21  ;;  %v320_v32 = vmul.f32 %v319_v25, %v1225_v0  ;;  %v321_v33 = vmul.f32 %v319_v25, %v1230_v1  ;;  %v324_v34 = vmul.f32 %v323_v26, %v1239_v2 }
  0x5e   :  { %v325_v35 = vmul.f32 %v323_v26, %v1244_v3  ;;  %v288_v36 = vadd.f32 %v286_v28, %v260_v16  ;;  %v308_v37 = vadd.f32 %v307_v19, %v304_v30  ;;  %v309_v38 = vadd.f32 %v307_v19, %v305_v31 }
  0x5f   :  { %v313_v39 = vstv %s1424_s9  ;;  %v326_v40 = vadd.f32 %v324_v34, %v320_v32  ;;  %v330_v42 = vmul.f32 %v329_v27, %v1251_v4  ;;  %v331_v43 = vmul.f32 %v329_v27, %v1256_v5  ;;  %s1544_s9 = sld [smem:[#allocation3 + $0x10f]] }
  0x60   :  { %v327_v41 = vadd.f32 %v325_v35, %v321_v33  ;;  %v289_v44 = vadd.f32 %v287_v29, %v261_v24  ;;  %v310_v45 = vmax.f32 %v308_v37, 0.0  ;;  %v311_v46 = vmax.f32 %v309_v38, 0.0 }
  0x61   :  { %v335_v47 = vstv %s1430_s3  ;;  %v332_v48 = vadd.f32 %v330_v42, %v326_v40  ;;  %v347_v50 = vstv %s1433_s10  ;;  %v351_v51 = vstv %s1435_s11  ;;  %s1548_s3 = sld [smem:[#allocation7 + $0xe]]  ;;  %s1554_s10 = sld [smem:[#allocation5 + $0xf]] }
  0x62   :  { %v333_v49 = vadd.f32 %v331_v43, %v327_v41  ;;  %v314_v52 = vmul.f32 %v313_v39, %v310_v45  ;;  %v315_v53 = vmul.f32 %v313_v39, %v311_v46  ;;  %v348_v54 = vmul.f32 %v347_v50, %v1225_v0  ;;  %s1558_s11 = sld [smem:[#allocation3 + $0x10]] }
  0x63   :  { %v349_v55 = vmul.f32 %v347_v50, %v1230_v1  ;;  %v336_v56 = vadd.f32 %v335_v47, %v332_v48  ;;  %v352_v58 = vmul.f32 %v351_v51, %v1239_v2  ;;  %v353_v59 = vmul.f32 %v351_v51, %v1244_v3 }
  0x64   :  { %v337_v57 = vadd.f32 %v335_v47, %v333_v49  ;;  %v316_v60 = vadd.f32 %v314_v52, %v288_v36  ;;  %v317_v61 = vadd.f32 %v315_v53, %v289_v44  ;;  %v341_v62 = vstv %s1442_s12  ;;  %s1560_s12 = sld [smem:[#allocation3 + $0x90]] }
  0x65   :  { %v357_v63 = vstv %s1444_s13  ;;  %v338_v6 = vmax.f32 %v336_v56, 0.0  ;;  %v354_v8 = vadd.f32 %v352_v58, %v348_v54  ;;  %v355_v9 = vadd.f32 %v353_v59, %v349_v55  ;;  %s1568_s13 = sld [smem:[#allocation7 + $0xf]] }
  0x66   :  { %v339_v7 = vmax.f32 %v337_v57, 0.0  ;;  %v358_v11 = vmul.f32 %v357_v63, %v1251_v4  ;;  %v359_v12 = vmul.f32 %v357_v63, %v1256_v5  ;;  %v363_v13 = vstv %s1451_s14  ;;  %s1570_s14 = sld [smem:[#allocation3 + $0x110]] }
  0x67   :  { %v375_v14 = vstv %s1453_s15  ;;  %v342_v10 = vmul.f32 %v341_v62, %v338_v6  ;;  %v379_v20 = vstv %s1458_s16  ;;  %v385_v21 = vstv %s1460_s17  ;;  %s1574_s15 = sld [smem:[#allocation5 + $0x10]]  ;;  %s1579_s16 = sld [smem:[#allocation3 + $0x11]] }
  0x68   :  { %v343_v15 = vmul.f32 %v341_v62, %v339_v7  ;;  %v376_v16 = vmul.f32 %v375_v14, %v1225_v0  ;;  %v377_v17 = vmul.f32 %v375_v14, %v1230_v1  ;;  %v360_v18 = vadd.f32 %v358_v11, %v354_v8  ;;  %s1583_s17 = sld [smem:[#allocation3 + $0x91]] }
  0x69   :  { %v361_v19 = vadd.f32 %v359_v12, %v355_v9  ;;  %v344_v22 = vadd.f32 %v342_v10, %v316_v60  ;;  %v369_v23 = vstv %s1464_s18  ;;  %v380_v24 = vmul.f32 %v379_v20, %v1239_v2  ;;  %s1585_s18 = sld [smem:[#allocation3 + $0x111]] }
  0x6a   :  { %v381_v25 = vmul.f32 %v379_v20, %v1244_v3  ;;  %v364_v26 = vadd.f32 %v363_v13, %v360_v18  ;;  %v386_v28 = vmul.f32 %v385_v21, %v1251_v4  ;;  %v387_v29 = vmul.f32 %v385_v21, %v1256_v5 }
  0x6b   :  { %v365_v27 = vadd.f32 %v363_v13, %v361_v19  ;;  %v345_v30 = vadd.f32 %v343_v15, %v317_v61  ;;  %v382_v31 = vadd.f32 %v380_v24, %v376_v16  ;;  %v391_v33 = vstv %s1470_s19  ;;  %s1592_s19 = sld [smem:[#allocation7 + $0x10]] }
  0x6c   :  { %v383_v32 = vadd.f32 %v381_v25, %v377_v17  ;;  %v366_v34 = vmax.f32 %v364_v26, 0.0  ;;  %v403_v36 = vstv %s1474_s20  ;;  %v407_v37 = vstv %s1476_s21  ;;  %s1598_s20 = sld [smem:[#allocation5 + $0x11]]  ;;  %s1601_s21 = sld [smem:[#allocation3 + $0x12]] }
  0x6d   :  { %v367_v35 = vmax.f32 %v365_v27, 0.0  ;;  %v388_v38 = vadd.f32 %v386_v28, %v382_v31  ;;  %v404_v40 = vmul.f32 %v403_v36, %v1225_v0  ;;  %v405_v41 = vmul.f32 %v403_v36, %v1230_v1 }
  0x6e   :  { %v389_v39 = vadd.f32 %v387_v29, %v383_v32  ;;  %v370_v42 = vmul.f32 %v369_v23, %v366_v34  ;;  %v408_v44 = vmul.f32 %v407_v37, %v1239_v2  ;;  %v409_v45 = vmul.f32 %v407_v37, %v1244_v3 }
  0x6f   :  { %v371_v43 = vmul.f32 %v369_v23, %v367_v35  ;;  %v392_v46 = vadd.f32 %v391_v33, %v388_v38  ;;  %v397_v48 = vstv %s1484_s22  ;;  %v413_v49 = vstv %s1486_s23  ;;  %s1603_s22 = sld [smem:[#allocation3 + $0x92]]  ;;  %s1610_s23 = sld [smem:[#allocation7 + $0x11]] }
  0x70   :  { %v393_v47 = vadd.f32 %v391_v33, %v389_v39  ;;  %v372_v50 = vadd.f32 %v370_v42, %v344_v22  ;;  %v410_v51 = vadd.f32 %v408_v44, %v404_v40  ;;  %v411_v52 = vadd.f32 %v409_v45, %v405_v41 }
  0x71   :  { %v419_v53 = vstv %s1490_s24  ;;  %v394_v54 = vmax.f32 %v392_v46, 0.0  ;;  %v414_v56 = vmul.f32 %v413_v49, %v1251_v4  ;;  %v415_v57 = vmul.f32 %v413_v49, %v1256_v5  ;;  %s1612_s24 = sld [smem:[#allocation3 + $0x112]] }
  0x72   :  { %v395_v55 = vmax.f32 %v393_v47, 0.0  ;;  %v373_v58 = vadd.f32 %v371_v43, %v345_v30  ;;  %v431_v59 = vstv %s1495_s25  ;;  %v435_v60 = vstv %s1499_s26  ;;  %s1619_s25 = sld [smem:[#allocation5 + $0x12]]  ;;  %s1621_s26 = sld [smem:[#allocation3 + $0x13]] }
  0x73   :  { %v441_v61 = vstv %s1501_s2  ;;  %v398_v62 = vmul.f32 %v397_v48, %v394_v54  ;;  %v416_v6 = vadd.f32 %v414_v56, %v410_v51  ;;  %v417_v7 = vadd.f32 %v415_v57, %v411_v52  ;;  %s1626_s2 = sld [smem:[#allocation3 + $0x93]] }
  0x74   :  { %v399_v63 = vmul.f32 %v397_v48, %v395_v55  ;;  %v432_v8 = vmul.f32 %v431_v59, %v1225_v0  ;;  %v433_v9 = vmul.f32 %v431_v59, %v1230_v1  ;;  %v436_v11 = vmul.f32 %v435_v60, %v1239_v2 }
  0x75   :  { %v437_v12 = vmul.f32 %v435_v60, %v1244_v3  ;;  %v400_v13 = vadd.f32 %v398_v62, %v372_v50  ;;  %v420_v14 = vadd.f32 %v419_v53, %v416_v6  ;;  %v421_v10 = vadd.f32 %v419_v53, %v417_v7 }
  0x76   :  { %v425_v15 = vstv %s1508_s1  ;;  %v438_v16 = vadd.f32 %v436_v11, %v432_v8  ;;  %v442_v18 = vmul.f32 %v441_v61, %v1251_v4  ;;  %v443_v19 = vmul.f32 %v441_v61, %v1256_v5  ;;  %s1628_s1 = sld [smem:[#allocation3 + $0x113]] }
  0x77   :  { %v439_v17 = vadd.f32 %v437_v12, %v433_v9  ;;  %v401_v20 = vadd.f32 %v399_v63, %v373_v58  ;;  %v422_v21 = vmax.f32 %v420_v14, 0.0  ;;  %v423_v22 = vmax.f32 %v421_v10, 0.0 }
  0x78   :  { %v447_v23 = vstv %s1514_s27  ;;  %v444_v24 = vadd.f32 %v442_v18, %v438_v16  ;;  %v459_v26 = vstv %s1517_s28  ;;  %v463_v27 = vstv %s1519_s29  ;;  %s1632_s27 = sld [smem:[#allocation7 + $0x12]]  ;;  %s1638_s28 = sld [smem:[#allocation5 + $0x13]] }
  0x79   :  { %v445_v25 = vadd.f32 %v443_v19, %v439_v17  ;;  %v426_v28 = vmul.f32 %v425_v15, %v422_v21  ;;  %v427_v29 = vmul.f32 %v425_v15, %v423_v22  ;;  %v460_v30 = vmul.f32 %v459_v26, %v1225_v0  ;;  %s1642_s29 = sld [smem:[#allocation3 + $0x14]] }
  0x7a   :  { %v461_v31 = vmul.f32 %v459_v26, %v1230_v1  ;;  %v448_v32 = vadd.f32 %v447_v23, %v444_v24  ;;  %v464_v34 = vmul.f32 %v463_v27, %v1239_v2  ;;  %v465_v35 = vmul.f32 %v463_v27, %v1244_v3 }
  0x7b   :  { %v449_v33 = vadd.f32 %v447_v23, %v445_v25  ;;  %v428_v36 = vadd.f32 %v426_v28, %v400_v13  ;;  %v429_v37 = vadd.f32 %v427_v29, %v401_v20  ;;  %v453_v38 = vstv %s1526_s4  ;;  %s1644_s4 = sld [smem:[#allocation3 + $0x94]] }
  0x7c   :  { %v469_v39 = vstv %s1528_s30  ;;  %v450_v40 = vmax.f32 %v448_v32, 0.0  ;;  %v466_v42 = vadd.f32 %v464_v34, %v460_v30  ;;  %v467_v43 = vadd.f32 %v465_v35, %v461_v31  ;;  %s1756_s30 = sld [smem:[#allocation3 + $0x18]] }
  0x7d   :  { %v451_v41 = vmax.f32 %v449_v33, 0.0  ;;  %v470_v44 = vmul.f32 %v469_v39, %v1251_v4  ;;  %v471_v45 = vmul.f32 %v469_v39, %v1256_v5  ;;  %v475_v46 = vstv %s1535_s6  ;;  %s1758_s6 = sld [smem:[#allocation3 + $0x98]] }
  0x7e   :  { %v487_v47 = vstv %s1537_s7  ;;  %v454_v48 = vmul.f32 %v453_v38, %v450_v40  ;;  %v491_v54 = vstv %s1542_s8  ;;  %v497_v55 = vstv %s1544_s9  ;;  %s1766_s7 = sld [smem:[#allocation7 + $0x17]]  ;;  %s1768_s8 = sld [smem:[#allocation3 + $0x118]] }
  0x7f   :  { %v455_v49 = vmul.f32 %v453_v38, %v451_v41  ;;  %v488_v50 = vmul.f32 %v487_v47, %v1225_v0  ;;  %v489_v51 = vmul.f32 %v487_v47, %v1230_v1  ;;  %v472_v52 = vadd.f32 %v470_v44, %v466_v42  ;;  %s1772_s9 = sld [smem:[#allocation5 + $0x18]] }
  0x80   :  { %v473_v53 = vadd.f32 %v471_v45, %v467_v43  ;;  %v456_v56 = vadd.f32 %v454_v48, %v428_v36  ;;  %v481_v57 = vstv %s1548_s3  ;;  %v492_v58 = vmul.f32 %v491_v54, %v1239_v2  ;;  %s1777_s3 = sld [smem:[#allocation3 + $0x19]] }
  0x81   :  { %v493_v59 = vmul.f32 %v491_v54, %v1244_v3  ;;  %v476_v60 = vadd.f32 %v475_v46, %v472_v52  ;;  %v498_v62 = vmul.f32 %v497_v55, %v1251_v4  ;;  %v499_v63 = vmul.f32 %v497_v55, %v1256_v5 }
  0x82   :  { %v477_v61 = vadd.f32 %v475_v46, %v473_v53  ;;  %v457_v6 = vadd.f32 %v455_v49, %v429_v37  ;;  %v494_v7 = vadd.f32 %v492_v58, %v488_v50  ;;  %v503_v9 = vstv %s1554_s10  ;;  %s1781_s10 = sld [smem:[#allocation3 + $0x99]] }
  0x83   :  { %v495_v8 = vadd.f32 %v493_v59, %v489_v51  ;;  %v478_v11 = vmax.f32 %v476_v60, 0.0  ;;  %v515_v13 = vstv %s1558_s11  ;;  %v519_v14 = vstv %s1560_s12  ;;  %s1672_s12 = sld [smem:[#allocation7 + $0x13]]  ;;  %s1783_s11 = sld [smem:[#allocation3 + $0x119]] }
  0x84   :  { %v479_v12 = vmax.f32 %v477_v61, 0.0  ;;  %v500_v10 = vadd.f32 %v498_v62, %v494_v7  ;;  %v516_v16 = vmul.f32 %v515_v13, %v1225_v0  ;;  %v517_v17 = vmul.f32 %v515_v13, %v1230_v1 }
  0x85   :  { %v501_v15 = vadd.f32 %v499_v63, %v495_v8  ;;  %v482_v18 = vmul.f32 %v481_v57, %v478_v11  ;;  %v520_v20 = vmul.f32 %v519_v14, %v1239_v2  ;;  %v521_v21 = vmul.f32 %v519_v14, %v1244_v3 }
  0x86   :  { %v483_v19 = vmul.f32 %v481_v57, %v479_v12  ;;  %v504_v22 = vadd.f32 %v503_v9, %v500_v10  ;;  %v509_v24 = vstv %s1568_s13  ;;  %v525_v25 = vstv %s1570_s14  ;;  %s1674_s13 = sld [smem:[#allocation3 + $0x114]] }
  0x87   :  { %v505_v23 = vadd.f32 %v503_v9, %v501_v15  ;;  %v484_v26 = vadd.f32 %v482_v18, %v456_v56  ;;  %v522_v27 = vadd.f32 %v520_v20, %v516_v16  ;;  %v523_v28 = vadd.f32 %v521_v21, %v517_v17  ;;  %v1655_v16 = vld [vmem:[%s1944_s0 + $0xa] sm:$0xff]  ;;  %s1678_s14 = sld [smem:[#allocation5 + $0x14]] }
  0x88   :  { %v531_v29 = vstv %s1574_s15  ;;  %v506_v30 = vmax.f32 %v504_v22, 0.0  ;;  %v526_v32 = vmul.f32 %v525_v25, %v1251_v4  ;;  %v527_v33 = vmul.f32 %v525_v25, %v1256_v5  ;;  %v1663_v22 = vld [vmem:[%s1944_s0] sm:$0xff]  ;;  %s1801_s15 = sld [smem:[#allocation3 + $0x9a]] }
  0x89   :  { %v507_v31 = vmax.f32 %v505_v23, 0.0  ;;  %v485_v34 = vadd.f32 %v483_v19, %v457_v6  ;;  %v543_v35 = vstv %s1579_s16  ;;  %v547_v36 = vstv %s1583_s17  ;;  %s1808_s16 = sld [smem:[#allocation7 + $0x19]]  ;;  %s1810_s17 = sld [smem:[#allocation3 + $0x11a]] }
  0x8a   :  { %v553_v37 = vstv %s1585_s18  ;;  %v510_v38 = vmul.f32 %v509_v24, %v506_v30  ;;  %v528_v40 = vadd.f32 %v526_v32, %v522_v27  ;;  %v529_v41 = vadd.f32 %v527_v33, %v523_v28  ;;  %v1684_v32 = vld [vmem:[%s1944_s0 + $0x1] sm:$0xff]  ;;  %s1817_s18 = sld [smem:[#allocation5 + $0x1a]] }
  0x8b   :  { %v511_v39 = vmul.f32 %v509_v24, %v507_v31  ;;  %v544_v42 = vmul.f32 %v543_v35, %v1225_v0  ;;  %v545_v43 = vmul.f32 %v543_v35, %v1230_v1  ;;  %v548_v44 = vmul.f32 %v547_v36, %v1239_v2  ;;  %v1669_v24 = vld [vmem:[%s1944_s0 + $0x8] sm:$0xff] }
  0x8c   :  { %v549_v45 = vmul.f32 %v547_v36, %v1244_v3  ;;  %v512_v46 = vadd.f32 %v510_v38, %v484_v26  ;;  %v532_v47 = vadd.f32 %v531_v29, %v528_v40  ;;  %v533_v48 = vadd.f32 %v531_v29, %v529_v41 }
  0x8d   :  { %v537_v49 = vstv %s1592_s19  ;;  %v550_v50 = vadd.f32 %v548_v44, %v544_v42  ;;  %v554_v52 = vmul.f32 %v553_v37, %v1251_v4  ;;  %v555_v53 = vmul.f32 %v553_v37, %v1256_v5  ;;  %s1693_s19 = sld [smem:[#allocation3 + $0x15]] }
  0x8e   :  { %v551_v51 = vadd.f32 %v549_v45, %v545_v43  ;;  %v513_v54 = vadd.f32 %v511_v39, %v485_v34  ;;  %v534_v55 = vmax.f32 %v532_v47, 0.0  ;;  %v535_v56 = vmax.f32 %v533_v48, 0.0  ;;  %v1690_v34 = vld [vmem:[%s1944_s0 + $0x9] sm:$0xff] }
  0x8f   :  { %v559_v57 = vstv %s1598_s20  ;;  %v556_v58 = vadd.f32 %v554_v52, %v550_v50  ;;  %v571_v60 = vstv %s1601_s21  ;;  %v575_v61 = vstv %s1603_s22  ;;  %s1697_s20 = sld [smem:[#allocation3 + $0x95]] }
  0x90   :  { %v557_v59 = vadd.f32 %v555_v53, %v551_v51  ;;  %v538_v62 = vmul.f32 %v537_v49, %v534_v55  ;;  %v539_v4 = vmul.f32 %v537_v49, %v535_v56  ;;  %v572_v5 = vmul.f32 %v571_v60, %v1225_v0  ;;  %s1699_s21 = sld [smem:[#allocation3 + $0x115]] }
  0x91   :  { %v573_v63 = vmul.f32 %v571_v60, %v1230_v1  ;;  %v560_v6 = vadd.f32 %v559_v57, %v556_v58  ;;  %v576_v8 = vmul.f32 %v575_v61, %v1239_v2  ;;  %v577_v9 = vmul.f32 %v575_v61, %v1244_v3  ;;  %v1649_v2 = vld [vmem:[%s1944_s0 + $0x2] sm:$0xff]  ;;  %s1706_s0 = sld [smem:[#allocation7 + $0x14]]  ;;  %s1712_s22 = sld [smem:[#allocation5 + $0x15]] }
  0x92   :  { %v561_v7 = vadd.f32 %v559_v57, %v557_v59  ;;  %v540_v11 = vadd.f32 %v538_v62, %v512_v46  ;;  %v541_v12 = vadd.f32 %v539_v4, %v513_v54  ;;  %v565_v13 = vstv %s1610_s23  ;;  %s1715_s23 = sld [smem:[#allocation3 + $0x16]] }
  0x93   :  { %v581_v14 = vstv %s1612_s24  ;;  %v562_v0 = vmax.f32 %v560_v6, 0.0  ;;  %v578_v10 = vadd.f32 %v576_v8, %v572_v5  ;;  %v579_v15 = vadd.f32 %v577_v9, %v573_v63  ;;  %s1717_s24 = sld [smem:[#allocation3 + $0x96]] }
  0x94   :  { %v563_v1 = vmax.f32 %v561_v7, 0.0  ;;  %v582_v3 = vmul.f32 %v1649_v2, %v581_v14  ;;  %v583_v17 = vmul.f32 %v1655_v16, %v581_v14  ;;  %v587_v18 = vstv %s1619_s25  ;;  %s1724_s25 = sld [smem:[#allocation7 + $0x15]] }
  0x95   :  { %v599_v19 = vstv %s1621_s26  ;;  %v566_v20 = vmul.f32 %v565_v13, %v562_v0  ;;  %v603_v28 = vstv %s1626_s2  ;;  %v609_v29 = vstv %s1628_s1  ;;  %s1726_s26 = sld [smem:[#allocation3 + $0x116]]  ;;  %s1735_s1 = sld [smem:[#allocation3 + $0x17]] }
  0x96   :  { %v567_v21 = vmul.f32 %v565_v13, %v563_v1  ;;  %v600_v23 = vmul.f32 %v1663_v22, %v599_v19  ;;  %v601_v25 = vmul.f32 %v1669_v24, %v599_v19  ;;  %v584_v26 = vadd.f32 %v582_v3, %v578_v10  ;;  %s1733_s2 = sld [smem:[#allocation5 + $0x16]] }
  0x97   :  { %v585_v27 = vadd.f32 %v583_v17, %v579_v15  ;;  %v568_v30 = vadd.f32 %v566_v20, %v540_v11  ;;  %v593_v31 = vstv %s1632_s27  ;;  %v604_v33 = vmul.f32 %v1684_v32, %v603_v28  ;;  %s1740_s27 = sld [smem:[#allocation3 + $0x97]] }
  0x98   :  { %v605_v35 = vmul.f32 %v1690_v34, %v603_v28  ;;  %v588_v36 = vadd.f32 %v587_v18, %v584_v26  ;;  %v610_v38 = vmul.f32 %v1649_v2, %v609_v29  ;;  %v611_v39 = vmul.f32 %v1655_v16, %v609_v29 }
  0x99   :  { %v589_v37 = vadd.f32 %v587_v18, %v585_v27  ;;  %v569_v40 = vadd.f32 %v567_v21, %v541_v12  ;;  %v606_v41 = vadd.f32 %v604_v33, %v600_v23  ;;  %v615_v43 = vstv %s1638_s28  ;;  %s1742_s28 = sld [smem:[#allocation3 + $0x117]] }
  0x9a   :  { %v607_v42 = vadd.f32 %v605_v35, %v601_v25  ;;  %v590_v44 = vmax.f32 %v588_v36, 0.0  ;;  %v627_v46 = vstv %s1642_s29  ;;  %v631_v47 = vstv %s1644_s4  ;;  %s1746_s29 = sld [smem:[#allocation7 + $0x16]]  ;;  %s1752_s4 = sld [smem:[#allocation5 + $0x17]] }
  0x9b   :  { %v591_v45 = vmax.f32 %v589_v37, 0.0  ;;  %v612_v48 = vadd.f32 %v610_v38, %v606_v41  ;;  %v628_v50 = vmul.f32 %v1663_v22, %v627_v46  ;;  %v629_v51 = vmul.f32 %v1669_v24, %v627_v46 }
  0x9c   :  { %v613_v49 = vadd.f32 %v611_v39, %v607_v42  ;;  %v594_v52 = vmul.f32 %v593_v31, %v590_v44  ;;  %v632_v54 = vmul.f32 %v1684_v32, %v631_v47  ;;  %v633_v55 = vmul.f32 %v1690_v34, %v631_v47 }
  0x9d   :  { %v595_v53 = vmul.f32 %v593_v31, %v591_v45  ;;  %v616_v56 = vadd.f32 %v615_v43, %v612_v48  ;;  %v621_v58 = vstv %s1672_s12  ;;  %v637_v59 = vstv %s1674_s13  ;;  %s1790_s12 = sld [smem:[#allocation7 + $0x18]]  ;;  %s1796_s13 = sld [smem:[#allocation5 + $0x19]] }
  0x9e   :  { %v617_v57 = vadd.f32 %v615_v43, %v613_v49  ;;  %v596_v60 = vadd.f32 %v594_v52, %v568_v30  ;;  %v634_v61 = vadd.f32 %v632_v54, %v628_v50  ;;  %v635_v62 = vadd.f32 %v633_v55, %v629_v51 }
  0x9f   :  { %v643_v4 = vstv %s1678_s14  ;;  %v618_v5 = vmax.f32 %v616_v56, 0.0  ;;  %v638_v6 = vmul.f32 %v1649_v2, %v637_v59  ;;  %v639_v7 = vmul.f32 %v1655_v16, %v637_v59  ;;  %s1799_s14 = sld [smem:[#allocation3 + $0x1a]] }
  0xa0   :  { %v619_v63 = vmax.f32 %v617_v57, 0.0  ;;  %v597_v8 = vadd.f32 %v595_v53, %v569_v40  ;;  %v655_v9 = vstv %s1693_s19  ;;  %v659_v11 = vstv %s1697_s20  ;;  %s1819_s19 = sld [smem:[#allocation3 + $0x1b]] }
  0xa1   :  { %v665_v12 = vstv %s1699_s21  ;;  %v622_v13 = vmul.f32 %v621_v58, %v618_v5  ;;  %v640_v0 = vadd.f32 %v638_v6, %v634_v61  ;;  %v641_v1 = vadd.f32 %v639_v7, %v635_v62  ;;  %s1824_s20 = sld [smem:[#allocation3 + $0x9b]] }
  0xa2   :  { %v623_v14 = vmul.f32 %v621_v58, %v619_v63  ;;  %v656_v10 = vmul.f32 %v1663_v22, %v655_v9  ;;  %v657_v15 = vmul.f32 %v1669_v24, %v655_v9  ;;  %v660_v3 = vmul.f32 %v1684_v32, %v659_v11  ;;  %s1826_s21 = sld [smem:[#allocation3 + $0x11b]] }
  0xa3   :  { %v661_v17 = vmul.f32 %v1690_v34, %v659_v11  ;;  %v624_v18 = vadd.f32 %v622_v13, %v596_v60  ;;  %v644_v19 = vadd.f32 %v643_v4, %v640_v0  ;;  %v645_v20 = vadd.f32 %v643_v4, %v641_v1 }
  0xa4   :  { %v649_v21 = vstv %s1706_s0  ;;  %v662_v23 = vadd.f32 %v660_v3, %v656_v10  ;;  %v666_v26 = vmul.f32 %v1649_v2, %v665_v12  ;;  %v667_v27 = vmul.f32 %v1655_v16, %v665_v12  ;;  %s1830_s0 = sld [smem:[#allocation7 + $0x1a]] }
  0xa5   :  { %v663_v25 = vadd.f32 %v661_v17, %v657_v15  ;;  %v625_v28 = vadd.f32 %v623_v14, %v597_v8  ;;  %v646_v29 = vmax.f32 %v644_v19, 0.0  ;;  %v647_v30 = vmax.f32 %v645_v20, 0.0 }
  0xa6   :  { %v671_v31 = vstv %s1712_s22  ;;  %v668_v33 = vadd.f32 %v666_v26, %v662_v23  ;;  %v683_v36 = vstv %s1715_s23  ;;  %v687_v37 = vstv %s1717_s24  ;;  %s1836_s22 = sld [smem:[#allocation5 + $0x1b]]  ;;  %s1840_s23 = sld [smem:[#allocation3 + $0x1c]] }
  0xa7   :  { %v669_v35 = vadd.f32 %v667_v27, %v663_v25  ;;  %v650_v38 = vmul.f32 %v649_v21, %v646_v29  ;;  %v651_v39 = vmul.f32 %v649_v21, %v647_v30  ;;  %v684_v40 = vmul.f32 %v1663_v22, %v683_v36  ;;  %s1842_s24 = sld [smem:[#allocation3 + $0x9c]] }
  0xa8   :  { %v685_v41 = vmul.f32 %v1669_v24, %v683_v36  ;;  %v672_v42 = vadd.f32 %v671_v31, %v668_v33  ;;  %v688_v44 = vmul.f32 %v1684_v32, %v687_v37  ;;  %v689_v45 = vmul.f32 %v1690_v34, %v687_v37 }
  0xa9   :  { %v673_v43 = vadd.f32 %v671_v31, %v669_v35  ;;  %v652_v46 = vadd.f32 %v650_v38, %v624_v18  ;;  %v653_v47 = vadd.f32 %v651_v39, %v625_v28  ;;  %v677_v48 = vstv %s1724_s25  ;;  %s1850_s25 = sld [smem:[#allocation7 + $0x1b]] }
  0xaa   :  { %v693_v49 = vstv %s1726_s26  ;;  %v674_v50 = vmax.f32 %v672_v42, 0.0  ;;  %v690_v52 = vadd.f32 %v688_v44, %v684_v40  ;;  %v691_v53 = vadd.f32 %v689_v45, %v685_v41  ;;  %s1852_s26 = sld [smem:[#allocation3 + $0x11c]] }
  0xab   :  { %v675_v51 = vmax.f32 %v673_v43, 0.0  ;;  %v694_v54 = vmul.f32 %v1649_v2, %v693_v49  ;;  %v695_v55 = vmul.f32 %v1655_v16, %v693_v49  ;;  %v699_v56 = vstv %s1733_s2  ;;  %s1856_s2 = sld [smem:[#allocation5 + $0x1c]] }
  0xac   :  { %v711_v57 = vstv %s1735_s1  ;;  %v678_v58 = vmul.f32 %v677_v48, %v674_v50  ;;  %v715_v5 = vstv %s1740_s27  ;;  %v721_v63 = vstv %s1742_s28  ;;  %s1861_s1 = sld [smem:[#allocation3 + $0x1d]] }
  0xad   :  { %v679_v59 = vmul.f32 %v677_v48, %v675_v51  ;;  %v712_v60 = vmul.f32 %v1663_v22, %v711_v57  ;;  %v713_v61 = vmul.f32 %v1669_v24, %v711_v57  ;;  %v696_v62 = vadd.f32 %v694_v54, %v690_v52  ;;  %s1865_s27 = sld [smem:[#allocation3 + $0x9d]] }
  0xae   :  { %v697_v4 = vadd.f32 %v695_v55, %v691_v53  ;;  %v680_v6 = vadd.f32 %v678_v58, %v652_v46  ;;  %v705_v7 = vstv %s1746_s29  ;;  %v716_v8 = vmul.f32 %v1684_v32, %v715_v5  ;;  %s1867_s28 = sld [smem:[#allocation3 + $0x11d]]  ;;  %s1874_s29 = sld [smem:[#allocation7 + $0x1c]] }
  0xaf   :  { %v717_v9 = vmul.f32 %v1690_v34, %v715_v5  ;;  %v700_v11 = vadd.f32 %v699_v56, %v696_v62  ;;  %v722_v13 = vmul.f32 %v1649_v2, %v721_v63  ;;  %v723_v14 = vmul.f32 %v1655_v16, %v721_v63 }
  0xb0   :  { %v701_v12 = vadd.f32 %v699_v56, %v697_v4  ;;  %v681_v0 = vadd.f32 %v679_v59, %v653_v47  ;;  %v718_v1 = vadd.f32 %v716_v8, %v712_v60  ;;  %v727_v15 = vstv %s1752_s4  ;;  %s1880_s4 = sld [smem:[#allocation5 + $0x1d]] }
  0xb1   :  { %v719_v10 = vadd.f32 %v717_v9, %v713_v61  ;;  %v702_v3 = vmax.f32 %v700_v11, 0.0  ;;  %v739_v18 = vstv %s1756_s30  ;;  %v743_v19 = vstv %s1758_s6  ;;  %s1883_s30 = sld [smem:[#allocation3 + $0x1e]] }
  0xb2   :  { %v703_v17 = vmax.f32 %v701_v12, 0.0  ;;  %v724_v20 = vadd.f32 %v722_v13, %v718_v1  ;;  %v740_v23 = vmul.f32 %v1663_v22, %v739_v18  ;;  %v741_v25 = vmul.f32 %v1669_v24, %v739_v18  ;;  %s1885_s6 = sld [smem:[#allocation3 + $0x9e]] }
  0xb3   :  { %v725_v21 = vadd.f32 %v723_v14, %v719_v10  ;;  %v706_v26 = vmul.f32 %v705_v7, %v702_v3  ;;  %v744_v28 = vmul.f32 %v1684_v32, %v743_v19  ;;  %v745_v29 = vmul.f32 %v1690_v34, %v743_v19 }
  0xb4   :  { %v707_v27 = vmul.f32 %v705_v7, %v703_v17  ;;  %v728_v30 = vadd.f32 %v727_v15, %v724_v20  ;;  %v733_v33 = vstv %s1766_s7  ;;  %v749_v35 = vstv %s1768_s8  ;;  %s1892_s7 = sld [smem:[#allocation7 + $0x1d]]  ;;  %s1894_s8 = sld [smem:[#allocation3 + $0x11e]] }
  0xb5   :  { %v729_v31 = vadd.f32 %v727_v15, %v725_v21  ;;  %v708_v36 = vadd.f32 %v706_v26, %v680_v6  ;;  %v746_v37 = vadd.f32 %v744_v28, %v740_v23  ;;  %v747_v38 = vadd.f32 %v745_v29, %v741_v25 }
  0xb6   :  { %v755_v39 = vstv %s1772_s9  ;;  %v730_v40 = vmax.f32 %v728_v30, 0.0  ;;  %v750_v42 = vmul.f32 %v1649_v2, %v749_v35  ;;  %v751_v43 = vmul.f32 %v1655_v16, %v749_v35  ;;  %s1901_s9 = sld [smem:[#allocation3 + $0x1f]] }
  0xb7   :  { %v731_v41 = vmax.f32 %v729_v31, 0.0  ;;  %v709_v44 = vadd.f32 %v707_v27, %v681_v0  ;;  %v767_v45 = vstv %s1777_s3  ;;  %v771_v46 = vstv %s1781_s10  ;;  %s1905_s3 = sld [smem:[#allocation5 + $0x1e]]  ;;  %s1908_s10 = sld [smem:[#allocation3 + $0x9f]] }
  0xb8   :  { %v777_v47 = vstv %s1783_s11  ;;  %v734_v48 = vmul.f32 %v733_v33, %v730_v40  ;;  %v752_v50 = vadd.f32 %v750_v42, %v746_v37  ;;  %v753_v51 = vadd.f32 %v751_v43, %v747_v38  ;;  %s1910_s11 = sld [smem:[#allocation3 + $0x11f]] }
  0xb9   :  { %v735_v49 = vmul.f32 %v733_v33, %v731_v41  ;;  %v768_v52 = vmul.f32 %v1663_v22, %v767_v45  ;;  %v769_v53 = vmul.f32 %v1669_v24, %v767_v45  ;;  %v772_v54 = vmul.f32 %v1684_v32, %v771_v46 }
  0xba   :  { %v773_v55 = vmul.f32 %v1690_v34, %v771_v46  ;;  %v736_v56 = vadd.f32 %v734_v48, %v708_v36  ;;  %v756_v57 = vadd.f32 %v755_v39, %v752_v50  ;;  %v757_v58 = vadd.f32 %v755_v39, %v753_v51 }
  0xbb   :  { %v761_v59 = vstv %s1790_s12  ;;  %v774_v60 = vadd.f32 %v772_v54, %v768_v52  ;;  %v778_v62 = vmul.f32 %v1649_v2, %v777_v47  ;;  %v779_v4 = vmul.f32 %v1655_v16, %v777_v47  ;;  %s1918_s12 = sld [smem:[#allocation7 + $0x1e]] }
  0xbc   :  { %v775_v61 = vadd.f32 %v773_v55, %v769_v53  ;;  %v737_v5 = vadd.f32 %v735_v49, %v709_v44  ;;  %v758_v63 = vmax.f32 %v756_v57, 0.0  ;;  %v759_v6 = vmax.f32 %v757_v58, 0.0 }
  0xbd   :  { %v783_v7 = vstv %s1796_s13  ;;  %v780_v8 = vadd.f32 %v778_v62, %v774_v60  ;;  %v795_v11 = vstv %s1799_s14  ;;  %v799_v12 = vstv %s1801_s15  ;;  %s1922_s13 = sld [smem:[#allocation5 + $0x1f]] }
  0xbe   :  { %v781_v9 = vadd.f32 %v779_v4, %v775_v61  ;;  %v762_v13 = vmul.f32 %v761_v59, %v758_v63  ;;  %v763_v14 = vmul.f32 %v761_v59, %v759_v6  ;;  %v796_v0 = vmul.f32 %v1663_v22, %v795_v11  ;;  %s1126_s14 = sld [smem:[#allocation7 + $0x1f]] }
  0xbf   :  { %v797_v1 = vmul.f32 %v1669_v24, %v795_v11  ;;  %v784_v10 = vadd.f32 %v783_v7, %v780_v8  ;;  %v800_v3 = vmul.f32 %v1684_v32, %v799_v12  ;;  %v801_v17 = vmul.f32 %v1690_v34, %v799_v12 }
  0xc0   :  { %v785_v15 = vadd.f32 %v783_v7, %v781_v9  ;;  %v764_v18 = vadd.f32 %v762_v13, %v736_v56  ;;  %v765_v19 = vadd.f32 %v763_v14, %v737_v5  ;;  %v789_v20 = vstv %s1808_s16 }
  0xc1   :  { %v805_v21 = vstv %s1810_s17  ;;  %v786_v23 = vmax.f32 %v784_v10, 0.0  ;;  %v802_v26 = vadd.f32 %v800_v3, %v796_v0  ;;  %v803_v27 = vadd.f32 %v801_v17, %v797_v1 }
  0xc2   :  { %v787_v25 = vmax.f32 %v785_v15, 0.0  ;;  %v806_v28 = vmul.f32 %v1649_v2, %v805_v21  ;;  %v807_v29 = vmul.f32 %v1655_v16, %v805_v21  ;;  %v811_v30 = vstv %s1817_s18 }
  0xc3   :  { %v823_v31 = vstv %s1819_s19  ;;  %v790_v33 = vmul.f32 %v789_v20, %v786_v23  ;;  %v827_v40 = vstv %s1824_s20  ;;  %v833_v41 = vstv %s1826_s21 }
  0xc4   :  { %v791_v35 = vmul.f32 %v789_v20, %v787_v25  ;;  %v824_v36 = vmul.f32 %v1663_v22, %v823_v31  ;;  %v825_v37 = vmul.f32 %v1669_v24, %v823_v31  ;;  %v808_v38 = vadd.f32 %v806_v28, %v802_v26 }
  0xc5   :  { %v809_v39 = vadd.f32 %v807_v29, %v803_v27  ;;  %v792_v42 = vadd.f32 %v790_v33, %v764_v18  ;;  %v817_v43 = vstv %s1830_s0  ;;  %v828_v44 = vmul.f32 %v1684_v32, %v827_v40 }
  0xc6   :  { %v829_v45 = vmul.f32 %v1690_v34, %v827_v40  ;;  %v812_v46 = vadd.f32 %v811_v30, %v808_v38  ;;  %v834_v48 = vmul.f32 %v1649_v2, %v833_v41  ;;  %v835_v49 = vmul.f32 %v1655_v16, %v833_v41 }
  0xc7   :  { %v813_v47 = vadd.f32 %v811_v30, %v809_v39  ;;  %v793_v50 = vadd.f32 %v791_v35, %v765_v19  ;;  %v830_v51 = vadd.f32 %v828_v44, %v824_v36  ;;  %v839_v53 = vstv %s1836_s22 }
  0xc8   :  { %v831_v52 = vadd.f32 %v829_v45, %v825_v37  ;;  %v814_v54 = vmax.f32 %v812_v46, 0.0  ;;  %v851_v56 = vstv %s1840_s23  ;;  %v855_v57 = vstv %s1842_s24 }
  0xc9   :  { %v815_v55 = vmax.f32 %v813_v47, 0.0  ;;  %v836_v58 = vadd.f32 %v834_v48, %v830_v51  ;;  %v852_v60 = vmul.f32 %v1663_v22, %v851_v56  ;;  %v853_v61 = vmul.f32 %v1669_v24, %v851_v56 }
  0xca   :  { %v837_v59 = vadd.f32 %v835_v49, %v831_v52  ;;  %v818_v62 = vmul.f32 %v817_v43, %v814_v54  ;;  %v856_v5 = vmul.f32 %v1684_v32, %v855_v57  ;;  %v857_v63 = vmul.f32 %v1690_v34, %v855_v57 }
  0xcb   :  { %v819_v4 = vmul.f32 %v817_v43, %v815_v55  ;;  %v840_v6 = vadd.f32 %v839_v53, %v836_v58  ;;  %v845_v8 = vstv %s1850_s25  ;;  %v861_v9 = vstv %s1852_s26 }
  0xcc   :  { %v841_v7 = vadd.f32 %v839_v53, %v837_v59  ;;  %v820_v11 = vadd.f32 %v818_v62, %v792_v42  ;;  %v858_v12 = vadd.f32 %v856_v5, %v852_v60  ;;  %v859_v13 = vadd.f32 %v857_v63, %v853_v61 }
  0xcd   :  { %v867_v14 = vstv %s1856_s2  ;;  %v842_v0 = vmax.f32 %v840_v6, 0.0  ;;  %v862_v10 = vmul.f32 %v1649_v2, %v861_v9  ;;  %v863_v15 = vmul.f32 %v1655_v16, %v861_v9 }
  0xce   :  { %v843_v1 = vmax.f32 %v841_v7, 0.0  ;;  %v821_v3 = vadd.f32 %v819_v4, %v793_v50  ;;  %v879_v17 = vstv %s1861_s1  ;;  %v883_v18 = vstv %s1865_s27 }
  0xcf   :  { %v889_v19 = vstv %s1867_s28  ;;  %v846_v20 = vmul.f32 %v845_v8, %v842_v0  ;;  %v864_v23 = vadd.f32 %v862_v10, %v858_v12  ;;  %v865_v25 = vadd.f32 %v863_v15, %v859_v13 }
  0xd0   :  { %v847_v21 = vmul.f32 %v845_v8, %v843_v1  ;;  %v880_v26 = vmul.f32 %v1663_v22, %v879_v17  ;;  %v881_v27 = vmul.f32 %v1669_v24, %v879_v17  ;;  %v884_v28 = vmul.f32 %v1684_v32, %v883_v18 }
  0xd1   :  { %v885_v29 = vmul.f32 %v1690_v34, %v883_v18  ;;  %v848_v30 = vadd.f32 %v846_v20, %v820_v11  ;;  %v868_v31 = vadd.f32 %v867_v14, %v864_v23  ;;  %v869_v33 = vadd.f32 %v867_v14, %v865_v25 }
  0xd2   :  { %v873_v35 = vstv %s1874_s29  ;;  %v886_v36 = vadd.f32 %v884_v28, %v880_v26  ;;  %v890_v38 = vmul.f32 %v1649_v2, %v889_v19  ;;  %v891_v39 = vmul.f32 %v1655_v16, %v889_v19 }
  0xd3   :  { %v887_v37 = vadd.f32 %v885_v29, %v881_v27  ;;  %v849_v40 = vadd.f32 %v847_v21, %v821_v3  ;;  %v870_v41 = vmax.f32 %v868_v31, 0.0  ;;  %v871_v42 = vmax.f32 %v869_v33, 0.0 }
  0xd4   :  { %v895_v43 = vstv %s1880_s4  ;;  %v892_v44 = vadd.f32 %v890_v38, %v886_v36  ;;  %v907_v46 = vstv %s1883_s30  ;;  %v911_v47 = vstv %s1885_s6 }
  0xd5   :  { %v893_v45 = vadd.f32 %v891_v39, %v887_v37  ;;  %v874_v48 = vmul.f32 %v873_v35, %v870_v41  ;;  %v875_v49 = vmul.f32 %v873_v35, %v871_v42  ;;  %v908_v50 = vmul.f32 %v1663_v22, %v907_v46 }
  0xd6   :  { %v909_v51 = vmul.f32 %v1669_v24, %v907_v46  ;;  %v896_v52 = vadd.f32 %v895_v43, %v892_v44  ;;  %v912_v54 = vmul.f32 %v1684_v32, %v911_v47  ;;  %v913_v55 = vmul.f32 %v1690_v34, %v911_v47 }
  0xd7   :  { %v897_v53 = vadd.f32 %v895_v43, %v893_v45  ;;  %v901_v56 = vstv %s1892_s7  ;;  %v917_v57 = vstv %s1894_s8  ;;  %v876_v62 = vadd.f32 %v874_v48, %v848_v30 }
  0xd8   :  { %v898_v58 = vmax.f32 %v896_v52, 0.0  ;;  %v914_v60 = vadd.f32 %v912_v54, %v908_v50  ;;  %v915_v61 = vadd.f32 %v913_v55, %v909_v51  ;;  %v918_v4 = vmul.f32 %v1649_v2, %v917_v57 }
  0xd9   :  { %v899_v59 = vmax.f32 %v897_v53, 0.0  ;;  %v919_v5 = vmul.f32 %v1655_v16, %v917_v57  ;;  %v935_v63 = vstv %s1901_s9  ;;  %v877_v6 = vadd.f32 %v875_v49, %v849_v40 }
  0xda   :  { %v923_v7 = vstv %s1905_s3  ;;  %v936_v8 = vmul.f32 %v1663_v22, %v935_v63  ;;  %v937_v9 = vmul.f32 %v1669_v24, %v935_v63  ;;  %v920_v11 = vadd.f32 %v918_v4, %v914_v60 }
  0xdb   :  { %v921_v12 = vadd.f32 %v919_v5, %v915_v61  ;;  %v939_v13 = vstv %s1908_s10  ;;  %v945_v14 = vstv %s1910_s11  ;;  %v902_v0 = vmul.f32 %v901_v56, %v898_v58 }
  0xdc   :  { %v903_v1 = vmul.f32 %v901_v56, %v899_v59  ;;  %v940_v10 = vmul.f32 %v1684_v32, %v939_v13  ;;  %v941_v15 = vmul.f32 %v1690_v34, %v939_v13  ;;  %v924_v3 = vadd.f32 %v923_v7, %v920_v11 }
  0xdd   :  { %v925_v17 = vadd.f32 %v923_v7, %v921_v12  ;;  %v946_v18 = vmul.f32 %v1649_v2, %v945_v14  ;;  %v947_v22 = vmul.f32 %v1655_v16, %v945_v14  ;;  %v929_v19 = vstv %s1918_s12 }
  0xde   :  { %v942_v24 = vadd.f32 %v940_v10, %v936_v8  ;;  %v943_v20 = vadd.f32 %v941_v15, %v937_v9  ;;  %v926_v21 = vmax.f32 %v924_v3, 0.0  ;;  %v951_v25 = vstv %s1922_s13 }
  0xdf   :  { %v927_v23 = vmax.f32 %v925_v17, 0.0  ;;  %v904_v26 = vadd.f32 %v902_v0, %v876_v62  ;;  %v905_v27 = vadd.f32 %v903_v1, %v877_v6  ;;  %v957_v33 = vstv %s1126_s14 }
  0xe0   :  { %v948_v28 = vadd.f32 %v946_v18, %v942_v24  ;;  %v949_v29 = vadd.f32 %v947_v22, %v943_v20  ;;  %v930_v30 = vmul.f32 %v929_v19, %v926_v21 }
  0xe1   :  { %v931_v32 = vmul.f32 %v929_v19, %v927_v23 }
  0xe2   :  { %v952_v31 = vadd.f32 %v951_v25, %v948_v28  ;;  %v953_v34 = vadd.f32 %v951_v25, %v949_v29  ;;  %v932_v35 = vadd.f32 %v930_v30, %v904_v26 }
  0xe3   :  { %v933_v36 = vadd.f32 %v931_v32, %v905_v27 }
  0xe4   :  { %v954_v2 = vmax.f32 %v952_v31, 0.0  ;;  %v955_v37 = vmax.f32 %v953_v34, 0.0 }
  0xe6   :  { %v958_v16 = vmul.f32 %v957_v33, %v954_v2  ;;  %v959_v38 = vmul.f32 %v957_v33, %v955_v37 }
  0xe8   :  { %v960_v39 = vadd.f32 %v958_v16, %v932_v35  ;;  %v961_v40 = vadd.f32 %v959_v38, %v933_v36 }
  0xea   :  { %962 = vst [vmem:[%s1949_s5] sm:$0xff] %v960_v39  ;;  %963 = vst [vmem:[%s1949_s5 + $0x8] sm:$0xff] %v961_v40 }
  0xeb   :  { %968 = vsyncpa [#allocation4], 1 }
  0xec   :  { %969 = vsyncpa [#allocation6], 1 }

</bundles_post_ra>
